<compile_context>
chip_gen: v7x
topology: tpu7x:2x2x1
jax: 0.10.0
libtpu: 0.0.40
codegen_flags: <defaults>
</compile_context>

<pallas_src>
import jax
import jax.numpy as jnp
from jax import lax
from jax.experimental import pallas as pl
from jax.experimental.pallas import tpu as pltpu

_VMEM_LIMIT = 48 * 1024 * 1024   # leave headroom on v7x (64 MiB physical / TC)


def _round_up(x, m):
    return ((x + m - 1) // m) * m


def _pick_chunk(T, Bp, Hp, Ip, Np, budget=16 * 1024 * 1024):
    """Largest time-chunk (from a fixed candidate list) whose working set fits the budget."""
    for c in (32, 16, 8, 4, 2, 1):
        if T % c != 0:
            continue
        tb = c * Bp
        need = 4 * (2 * tb * Ip + 2 * tb * Np            # pipelined x / dec blocks (double-buffered)
                    + tb * 3 * Hp + tb * Hp + Bp * Hp     # gx / hs / h VMEM scratch
                    + Ip * 3 * Hp + Hp * 3 * Hp           # W_ih, W_hh (resident)
                    + Hp * Np + 3 * Hp + Np + Bp * Hp)    # W_dec, biases
        if need <= budget:
            return c
    return 1


# --------------------------- fused GRU + decoder kernel ---------------------------

def _gru_fused_kernel(x_ref, h0_ref, wih_ref, bgx_ref, whh_ref, bhn_ref,
                      wdec_ref, bdec_ref, dec_ref, hT_ref,
                      gx_scratch, hs_scratch, h_scratch):
    """One time-chunk of the CustomGRU recurrence + decoder.

    x_ref:    (t_chunk*Bp, Ip)   padded inputs for this chunk (time-major, batch flattened)
    h0_ref:   (Bp, Hp)           initial hidden state (used only on the first chunk)
    wih_ref:  (Ip, 3Hp)          input->gate weights, per-gate lane-aligned slots
    bgx_ref:  (1, 3Hp)           fused x-gate bias (r,z: b_ih+b_hh; n: b_ih)
    whh_ref:  (Hp, 3Hp)          recurrent weights, per-gate lane-aligned slots
    bhn_ref:  (Bp, Hp)           b_hh of the candidate gate, pre-broadcast
    wdec_ref: (Hp, Np)           decoder weights
    bdec_ref: (1, Np)            decoder bias
    dec_ref:  (t_chunk*Bp, Np)   decoded outputs for this chunk (streamed out)
    hT_ref:   (Bp, Hp)           final hidden state (resident output block)
    gx_scratch/hs_scratch/h_scratch: VMEM scratch
    """
    Bp, Hp = h0_ref.shape
    n_steps = x_ref.shape[0] // Bp

    @pl.when(pl.program_id(0) == 0)
    def _():
        h_scratch[...] = h0_ref[...]

    # (1) time-parallel input-gate matmul for the whole chunk (MXU-dense).
    gx_scratch[...] = (jnp.dot(x_ref[...], wih_ref[...],
                               preferred_element_type=jnp.float32)
                       + bgx_ref[...])

    # (2) serial recurrence: only h @ W_hh remains on the critical path.
    @pl.loop(0, n_steps, unroll=True)
    def _(t):
        off = pl.multiple_of(t * Bp, Bp)
        h_t = h_scratch[...]                                     # (Bp, Hp)
        gx = gx_scratch[pl.ds(off, Bp), :]                       # (Bp, 3Hp)
        gh = jnp.dot(h_t, whh_ref[...],
                     preferred_element_type=jnp.float32)         # (Bp, 3Hp) — only serial matmul
        r = jax.nn.sigmoid(gx[:, 0:Hp] + gh[:, 0:Hp])
        z = jax.nn.sigmoid(gx[:, Hp:2 * Hp] + gh[:, Hp:2 * Hp])
        n = jnp.tanh(gx[:, 2 * Hp:] + r * (gh[:, 2 * Hp:] + bhn_ref[...]))  # nonlinearity = tanh
        h_new = n + z * (h_t - n)
        h_scratch[...] = h_new
        hs_scratch[pl.ds(off, Bp), :] = h_new

    # (3) time-parallel decoder over the chunk's hidden states (MXU-dense, lane-dense out).
    dec_ref[...] = (jnp.dot(hs_scratch[...], wdec_ref[...],
                            preferred_element_type=jnp.float32)
                    + bdec_ref[...]).astype(dec_ref.dtype)
    hT_ref[...] = h_scratch[...]


# ----------------------------------- wrapper ---------------------------------------

def rnn_model_forward(x, hidden, params, t_chunk=None):
    """Mimics RNNModel.forward(input, hidden) for rnn_type='tanh-GRU'.

    x:      (seq, batch, ninp) float32  (already-embedded input; encoder = identity)
    hidden: (1, batch, nhid)   float32
    returns (decoded (seq, batch, nout), hidden (1, batch, nhid))
    """
    T, B, ninp = x.shape
    H = hidden.shape[-1]
    nout = params["w_dec"].shape[0]

    Bp = _round_up(B, 8)          # sublanes
    Hp = _round_up(H, 128)        # lanes
    Np = _round_up(nout, 128)     # lane-dense decoder output
    Ip = _round_up(ninp, 128)

    if t_chunk is None:
        t_chunk = _pick_chunk(T, Bp, Hp, Ip, Np)

    f32 = jnp.float32
    wih_t = params["w_ih"].astype(f32).T          # (ninp, 3H)
    whh_t = params["w_hh"].astype(f32).T          # (H, 3H)
    b_ih = params["b_ih"].astype(f32)
    b_hh = params["b_hh"].astype(f32)

    # Per-gate lane-aligned weight slots + fused biases (r,z: b_ih+b_hh folded into the
    # x-gate bias; n: only b_ih folded, b_hh_n must stay inside r_t * (.)).
    wih_p = jnp.zeros((Ip, 3 * Hp), f32)
    whh_p = jnp.zeros((Hp, 3 * Hp), f32)
    b_gx = jnp.zeros((1, 3 * Hp), f32)
    for g in range(3):
        wih_p = wih_p.at[:ninp, g * Hp:g * Hp + H].set(wih_t[:, g * H:(g + 1) * H])
        whh_p = whh_p.at[:H, g * Hp:g * Hp + H].set(whh_t[:, g * H:(g + 1) * H])
        bg = b_ih[g * H:(g + 1) * H]
        if g < 2:
            bg = bg + b_hh[g * H:(g + 1) * H]
        b_gx = b_gx.at[0, g * Hp:g * Hp + H].set(bg)
    bhn = jnp.zeros((Bp, Hp), f32).at[:, :H].set(
        jnp.broadcast_to(b_hh[2 * H:3 * H], (Bp, H)))

    wdec_p = jnp.zeros((Hp, Np), f32).at[:H, :nout].set(params["w_dec"].astype(f32).T)
    bdec_p = jnp.zeros((1, Np), f32).at[0, :nout].set(params["b_dec"].astype(f32))

    # Pad activations; flatten (time, batch) so in-kernel slices are plain sublane windows.
    x_p = jnp.zeros((T, Bp, Ip), f32).at[:, :B, :ninp].set(x.astype(f32))
    x_p = x_p.reshape(T * Bp, Ip)
    h0_p = jnp.zeros((Bp, Hp), f32).at[:B, :H].set(hidden.astype(f32).reshape(B, H))

    TB = t_chunk * Bp
    dec_p, hT_p = pl.pallas_call(
        _gru_fused_kernel,
        out_shape=(jax.ShapeDtypeStruct((T * Bp, Np), f32),
                   jax.ShapeDtypeStruct((Bp, Hp), f32)),
        grid_spec=pltpu.PrefetchScalarGridSpec(
            num_scalar_prefetch=0,
            grid=(T // t_chunk,),
            in_specs=[
                pl.BlockSpec((TB, Ip), lambda c: (c, 0)),          # x chunk (pipelined)
                pl.BlockSpec((Bp, Hp), lambda c: (0, 0)),          # h0
                pl.BlockSpec((Ip, 3 * Hp), lambda c: (0, 0)),      # W_ih
                pl.BlockSpec((1, 3 * Hp), lambda c: (0, 0)),       # fused x-gate bias
                pl.BlockSpec((Hp, 3 * Hp), lambda c: (0, 0)),      # W_hh
                pl.BlockSpec((Bp, Hp), lambda c: (0, 0)),          # b_hh_n (broadcast)
                pl.BlockSpec((Hp, Np), lambda c: (0, 0)),          # W_dec
                pl.BlockSpec((1, Np), lambda c: (0, 0)),           # b_dec
            ],
            out_specs=[
                pl.BlockSpec((TB, Np), lambda c: (c, 0)),          # decoded chunk (streamed)
                pl.BlockSpec((Bp, Hp), lambda c: (0, 0)),          # final hidden (resident)
            ],
            scratch_shapes=[
                pltpu.VMEM((TB, 3 * Hp), f32),                     # chunk input gates
                pltpu.VMEM((TB, Hp), f32),                         # chunk hidden states
                pltpu.VMEM((Bp, Hp), f32),                         # carried hidden state
            ],
        ),
        compiler_params=pltpu.CompilerParams(
            dimension_semantics=("arbitrary",),                    # true recurrence over chunks
            vmem_limit_bytes=_VMEM_LIMIT),
    )(x_p, h0_p, wih_p, b_gx, whh_p, bhn, wdec_p, bdec_p)

    decoded = dec_p.reshape(T, Bp, Np)[:, :B, :nout]
    hT = hT_p[:B, :H].reshape(1, B, H)
    return decoded, hT


# ------------------------------ init + reference -----------------------------------

def init_params(key, ninp, nhid, nout):
    """Deterministic init matching the PyTorch module's init schemes."""
    k = jnp.sqrt(jnp.float32(nhid))          # CustomGRU.init_weights: U(-sqrt(H), sqrt(H))
    ks = jax.random.split(key, 6)
    return {
        "w_ih": jax.random.uniform(ks[0], (3 * nhid, ninp), jnp.float32, -k, k),
        "w_hh": jax.random.uniform(ks[1], (3 * nhid, nhid), jnp.float32, -k, k),
        "b_ih": jax.random.uniform(ks[2], (3 * nhid,), jnp.float32, -k, k),
        "b_hh": jax.random.uniform(ks[3], (3 * nhid,), jnp.float32, -k, k),
        # RNNModel.init_weights: decoder.weight ~ U(0,1), decoder.bias = 0
        "w_dec": jax.random.uniform(ks[4], (nout, nhid), jnp.float32, 0.0, 1.0),
        "b_dec": jnp.zeros((nout,), jnp.float32),
    }


def reference_forward(x, hidden, params):
    """Pure-JAX reference of CustomGRU + decoder, for verification."""
    H = hidden.shape[-1]
    h = hidden.reshape(hidden.shape[1], H)

    def step(h, x_t):
        gi = x_t @ params["w_ih"].T + params["b_ih"]
        gh = h @ params["w_hh"].T + params["b_hh"]
        i_r, i_z, i_n = jnp.split(gi, 3, axis=1)
        h_r, h_z, h_n = jnp.split(gh, 3, axis=1)
        r = jax.nn.sigmoid(i_r + h_r)
        z = jax.nn.sigmoid(i_z + h_z)
        n = jnp.tanh(i_n + r * h_n)
        h_new = n + z * (h - n)
        return h_new, h_new

    hT, hs = lax.scan(step, h, x)
    dec = hs @ params["w_dec"].T + params["b_dec"]
    return dec, hT.reshape(1, *hT.shape)


if __name__ == "__main__":
    seq, batch, ninp, nhid, nout = 8, 2, 16, 32, 10

    key = jax.random.PRNGKey(0)
    k_x, k_p = jax.random.split(key)
    x = jax.random.normal(k_x, (seq, batch, ninp), jnp.float32)
    hidden0 = jnp.zeros((1, batch, nhid), jnp.float32)      # RNNModel.init_hidden
    params = init_params(k_p, ninp, nhid, nout)

    decoded, hidden = jax.block_until_ready(rnn_model_forward(x, hidden0, params))

    ref_dec, ref_hid = reference_forward(x, hidden0, params)
    assert decoded.shape == (seq, batch, nout)
    assert hidden.shape == (1, batch, nhid)
    assert jnp.allclose(decoded, ref_dec, atol=1e-3, rtol=1e-3)
    assert jnp.allclose(hidden, ref_hid, atol=1e-3, rtol=1e-3)

    print("KERNEL_OK")
</pallas_src>

<mosaic_0001>
module attributes {stable_mosaic.version = 11 : i64} {
  func.func @_gru_fused_kernel(%arg0: i32, %arg1: memref<64x128xf32, #tpu.memory_space<vmem>>, %arg2: memref<8x128xf32, #tpu.memory_space<vmem>>, %arg3: memref<128x384xf32, #tpu.memory_space<vmem>>, %arg4: memref<1x384xf32, #tpu.memory_space<vmem>>, %arg5: memref<128x384xf32, #tpu.memory_space<vmem>>, %arg6: memref<8x128xf32, #tpu.memory_space<vmem>>, %arg7: memref<128x128xf32, #tpu.memory_space<vmem>>, %arg8: memref<1x128xf32, #tpu.memory_space<vmem>>, %arg9: memref<64x128xf32, #tpu.memory_space<vmem>>, %arg10: memref<8x128xf32, #tpu.memory_space<vmem>>, %arg11: memref<64x384xf32, #tpu.memory_space<vmem>>, %arg12: memref<64x128xf32, #tpu.memory_space<vmem>>, %arg13: memref<8x128xf32, #tpu.memory_space<vmem>>) attributes {dimension_semantics = [#tpu.dimension_semantics<arbitrary>], iteration_bounds = array<i64: 1>, scalar_prefetch = 0 : i64, scratch_operands = 3 : i64, tpu.core_type = #tpu.core_type<tc>, window_params = [{transform_indices = @transform_0, window_bounds = array<i64: 64, 128>}, {pipeline_mode = #tpu.pipeline_mode<synchronous>, transform_indices = @transform_1, window_bounds = array<i64: 8, 128>}, {pipeline_mode = #tpu.pipeline_mode<synchronous>, transform_indices = @transform_2, window_bounds = array<i64: 128, 384>}, {pipeline_mode = #tpu.pipeline_mode<synchronous>, transform_indices = @transform_3, window_bounds = array<i64: 1, 384>}, {pipeline_mode = #tpu.pipeline_mode<synchronous>, transform_indices = @transform_4, window_bounds = array<i64: 128, 384>}, {pipeline_mode = #tpu.pipeline_mode<synchronous>, transform_indices = @transform_5, window_bounds = array<i64: 8, 128>}, {pipeline_mode = #tpu.pipeline_mode<synchronous>, transform_indices = @transform_6, window_bounds = array<i64: 128, 128>}, {pipeline_mode = #tpu.pipeline_mode<synchronous>, transform_indices = @transform_7, window_bounds = array<i64: 1, 128>}, {transform_indices = @transform_8, window_bounds = array<i64: 64, 128>}, {pipeline_mode = #tpu.pipeline_mode<synchronous>, transform_indices = @transform_9, window_bounds = array<i64: 8, 128>}]} {
    %c0_i32 = arith.constant 0 : i32
    %0 = arith.cmpi eq, %arg0, %c0_i32 : i32
    %1 = arith.extui %0 : i1 to i32
    %c0_i32_0 = arith.constant 0 : i32
    %2 = arith.cmpi ne, %1, %c0_i32_0 : i32
    scf.if %2 {
      %c0_150 = arith.constant 0 : index
      %c0_151 = arith.constant 0 : index
      %323 = vector.load %arg2[%c0_150, %c0_151] : memref<8x128xf32, #tpu.memory_space<vmem>>, vector<8x128xf32>
      %c0_152 = arith.constant 0 : index
      %c0_153 = arith.constant 0 : index
      %324 = vector.load %arg13[%c0_152, %c0_153] : memref<8x128xf32, #tpu.memory_space<vmem>>, vector<8x128xf32>
      tpu.vector_store %arg13[%c0_152, %c0_153], %323 {strides = array<i32>} : memref<8x128xf32, #tpu.memory_space<vmem>>, vector<8x128xf32>,
    } else {
    }
    %c0 = arith.constant 0 : index
    %c0_1 = arith.constant 0 : index
    %3 = vector.load %arg1[%c0, %c0_1] : memref<64x128xf32, #tpu.memory_space<vmem>>, vector<64x128xf32>
    %c0_2 = arith.constant 0 : index
    %c0_3 = arith.constant 0 : index
    %4 = vector.load %arg3[%c0_2, %c0_3] : memref<128x384xf32, #tpu.memory_space<vmem>>, vector<128x384xf32>
    %cst = arith.constant dense<0.000000e+00> : vector<64x384xf32>
    %5 = tpu.matmul %3, %4, %cst {dimension_numbers = #tpu.dot_dimension_numbers<[1], [0], [0], [1], [0, 0, 1, 1], [], []>} : vector<64x128xf32>, vector<128x384xf32>, vector<64x384xf32> -> vector<64x384xf32>
    %c0_4 = arith.constant 0 : index
    %c0_5 = arith.constant 0 : index
    %6 = vector.load %arg4[%c0_4, %c0_5] : memref<1x384xf32, #tpu.memory_space<vmem>>, vector<1x384xf32>
    %7 = vector.broadcast %6 : vector<1x384xf32> to vector<64x384xf32>
    %8 = arith.addf %5, %7 : vector<64x384xf32>
    %c0_6 = arith.constant 0 : index
    %c0_7 = arith.constant 0 : index
    %9 = vector.load %arg11[%c0_6, %c0_7] : memref<64x384xf32, #tpu.memory_space<vmem>>, vector<64x384xf32>
    tpu.vector_store %arg11[%c0_6, %c0_7], %8 {strides = array<i32>} : memref<64x384xf32, #tpu.memory_space<vmem>>, vector<64x384xf32>,
    %c0_i32_8 = arith.constant 0 : i32
    %c1_i32 = arith.constant 1 : i32
    %10 = arith.muli %c0_i32_8, %c1_i32 : i32
    %c0_i32_9 = arith.constant 0 : i32
    %11 = arith.addi %c0_i32_9, %10 : i32
    %c8_i32 = arith.constant 8 : i32
    %12 = arith.muli %11, %c8_i32 : i32
    %13 = tpu.assume_multiple %12, 8 : i32
    %c0_10 = arith.constant 0 : index
    %c0_11 = arith.constant 0 : index
    %14 = vector.load %arg13[%c0_10, %c0_11] : memref<8x128xf32, #tpu.memory_space<vmem>>, vector<8x128xf32>
    %15 = arith.index_cast %13 : i32 to index
    %c0_12 = arith.constant 0 : index
    %16 = vector.load %arg11[%15, %c0_12] : memref<64x384xf32, #tpu.memory_space<vmem>>, vector<8x384xf32>
    %c0_13 = arith.constant 0 : index
    %c0_14 = arith.constant 0 : index
    %17 = vector.load %arg5[%c0_13, %c0_14] : memref<128x384xf32, #tpu.memory_space<vmem>>, vector<128x384xf32>
    %cst_15 = arith.constant dense<0.000000e+00> : vector<8x384xf32>
    %18 = tpu.matmul %14, %17, %cst_15 {dimension_numbers = #tpu.dot_dimension_numbers<[1], [0], [0], [1], [0, 0, 1, 1], [], []>} : vector<8x128xf32>, vector<128x384xf32>, vector<8x384xf32> -> vector<8x384xf32>
    %19 = vector.extract_strided_slice %16 {offsets = [0, 0], sizes = [8, 128], strides = [1, 1]} : vector<8x384xf32> to vector<8x128xf32>
    %20 = vector.extract_strided_slice %18 {offsets = [0, 0], sizes = [8, 128], strides = [1, 1]} : vector<8x384xf32> to vector<8x128xf32>
    %21 = arith.addf %19, %20 : vector<8x128xf32>
    %22 = arith.negf %21 : vector<8x128xf32>
    %23 = math.exp %22 : vector<8x128xf32>
    %cst_16 = arith.constant 1.000000e+00 : f32
    %24 = vector.broadcast %cst_16 : f32 to vector<8x128xf32>
    %25 = arith.addf %24, %23 : vector<8x128xf32>
    %26 = arith.divf %24, %25 : vector<8x128xf32>
    %27 = vector.extract_strided_slice %16 {offsets = [0, 128], sizes = [8, 128], strides = [1, 1]} : vector<8x384xf32> to vector<8x128xf32>
    %28 = vector.extract_strided_slice %18 {offsets = [0, 128], sizes = [8, 128], strides = [1, 1]} : vector<8x384xf32> to vector<8x128xf32>
    %29 = arith.addf %27, %28 : vector<8x128xf32>
    %30 = arith.negf %29 : vector<8x128xf32>
    %31 = math.exp %30 : vector<8x128xf32>
    %cst_17 = arith.constant 1.000000e+00 : f32
    %32 = vector.broadcast %cst_17 : f32 to vector<8x128xf32>
    %33 = arith.addf %32, %31 : vector<8x128xf32>
    %34 = arith.divf %32, %33 : vector<8x128xf32>
    %35 = vector.extract_strided_slice %16 {offsets = [0, 256], sizes = [8, 128], strides = [1, 1]} : vector<8x384xf32> to vector<8x128xf32>
    %36 = vector.extract_strided_slice %18 {offsets = [0, 256], sizes = [8, 128], strides = [1, 1]} : vector<8x384xf32> to vector<8x128xf32>
    %c0_18 = arith.constant 0 : index
    %c0_19 = arith.constant 0 : index
    %37 = vector.load %arg6[%c0_18, %c0_19] : memref<8x128xf32, #tpu.memory_space<vmem>>, vector<8x128xf32>
    %38 = arith.addf %36, %37 : vector<8x128xf32>
    %39 = arith.mulf %26, %38 : vector<8x128xf32>
    %40 = arith.addf %35, %39 : vector<8x128xf32>
    %41 = math.tanh %40 : vector<8x128xf32>
    %42 = arith.subf %14, %41 : vector<8x128xf32>
    %43 = arith.mulf %34, %42 : vector<8x128xf32>
    %44 = arith.addf %41, %43 : vector<8x128xf32>
    %c0_20 = arith.constant 0 : index
    %c0_21 = arith.constant 0 : index
    %45 = vector.load %arg13[%c0_20, %c0_21] : memref<8x128xf32, #tpu.memory_space<vmem>>, vector<8x128xf32>
    tpu.vector_store %arg13[%c0_20, %c0_21], %44 {strides = array<i32>} : memref<8x128xf32, #tpu.memory_space<vmem>>, vector<8x128xf32>,
    %46 = arith.index_cast %13 : i32 to index
    %c0_22 = arith.constant 0 : index
    %47 = vector.load %arg12[%46, %c0_22] : memref<64x128xf32, #tpu.memory_space<vmem>>, vector<8x128xf32>
    tpu.vector_store %arg12[%46, %c0_22], %44 {strides = array<i32>} : memref<64x128xf32, #tpu.memory_space<vmem>>, vector<8x128xf32>,
    %c1_i32_23 = arith.constant 1 : i32
    %c1_i32_24 = arith.constant 1 : i32
    %48 = arith.muli %c1_i32_23, %c1_i32_24 : i32
    %c0_i32_25 = arith.constant 0 : i32
    %49 = arith.addi %c0_i32_25, %48 : i32
    %c8_i32_26 = arith.constant 8 : i32
    %50 = arith.muli %49, %c8_i32_26 : i32
    %51 = tpu.assume_multiple %50, 8 : i32
    %c0_27 = arith.constant 0 : index
    %c0_28 = arith.constant 0 : index
    %52 = vector.load %arg13[%c0_27, %c0_28] : memref<8x128xf32, #tpu.memory_space<vmem>>, vector<8x128xf32>
    %53 = arith.index_cast %51 : i32 to index
    %c0_29 = arith.constant 0 : index
    %54 = vector.load %arg11[%53, %c0_29] : memref<64x384xf32, #tpu.memory_space<vmem>>, vector<8x384xf32>
    %c0_30 = arith.constant 0 : index
    %c0_31 = arith.constant 0 : index
    %55 = vector.load %arg5[%c0_30, %c0_31] : memref<128x384xf32, #tpu.memory_space<vmem>>, vector<128x384xf32>
    %cst_32 = arith.constant dense<0.000000e+00> : vector<8x384xf32>
    %56 = tpu.matmul %52, %55, %cst_32 {dimension_numbers = #tpu.dot_dimension_numbers<[1], [0], [0], [1], [0, 0, 1, 1], [], []>} : vector<8x128xf32>, vector<128x384xf32>, vector<8x384xf32> -> vector<8x384xf32>
    %57 = vector.extract_strided_slice %54 {offsets = [0, 0], sizes = [8, 128], strides = [1, 1]} : vector<8x384xf32> to vector<8x128xf32>
    %58 = vector.extract_strided_slice %56 {offsets = [0, 0], sizes = [8, 128], strides = [1, 1]} : vector<8x384xf32> to vector<8x128xf32>
    %59 = arith.addf %57, %58 : vector<8x128xf32>
    %60 = arith.negf %59 : vector<8x128xf32>
    %61 = math.exp %60 : vector<8x128xf32>
    %cst_33 = arith.constant 1.000000e+00 : f32
    %62 = vector.broadcast %cst_33 : f32 to vector<8x128xf32>
    %63 = arith.addf %62, %61 : vector<8x128xf32>
    %64 = arith.divf %62, %63 : vector<8x128xf32>
    %65 = vector.extract_strided_slice %54 {offsets = [0, 128], sizes = [8, 128], strides = [1, 1]} : vector<8x384xf32> to vector<8x128xf32>
    %66 = vector.extract_strided_slice %56 {offsets = [0, 128], sizes = [8, 128], strides = [1, 1]} : vector<8x384xf32> to vector<8x128xf32>
    %67 = arith.addf %65, %66 : vector<8x128xf32>
    %68 = arith.negf %67 : vector<8x128xf32>
    %69 = math.exp %68 : vector<8x128xf32>
    %cst_34 = arith.constant 1.000000e+00 : f32
    %70 = vector.broadcast %cst_34 : f32 to vector<8x128xf32>
    %71 = arith.addf %70, %69 : vector<8x128xf32>
    %72 = arith.divf %70, %71 : vector<8x128xf32>
    %73 = vector.extract_strided_slice %54 {offsets = [0, 256], sizes = [8, 128], strides = [1, 1]} : vector<8x384xf32> to vector<8x128xf32>
    %74 = vector.extract_strided_slice %56 {offsets = [0, 256], sizes = [8, 128], strides = [1, 1]} : vector<8x384xf32> to vector<8x128xf32>
    %c0_35 = arith.constant 0 : index
    %c0_36 = arith.constant 0 : index
    %75 = vector.load %arg6[%c0_35, %c0_36] : memref<8x128xf32, #tpu.memory_space<vmem>>, vector<8x128xf32>
    %76 = arith.addf %74, %75 : vector<8x128xf32>
    %77 = arith.mulf %64, %76 : vector<8x128xf32>
    %78 = arith.addf %73, %77 : vector<8x128xf32>
    %79 = math.tanh %78 : vector<8x128xf32>
    %80 = arith.subf %52, %79 : vector<8x128xf32>
    %81 = arith.mulf %72, %80 : vector<8x128xf32>
    %82 = arith.addf %79, %81 : vector<8x128xf32>
    %c0_37 = arith.constant 0 : index
    %c0_38 = arith.constant 0 : index
    %83 = vector.load %arg13[%c0_37, %c0_38] : memref<8x128xf32, #tpu.memory_space<vmem>>, vector<8x128xf32>
    tpu.vector_store %arg13[%c0_37, %c0_38], %82 {strides = array<i32>} : memref<8x128xf32, #tpu.memory_space<vmem>>, vector<8x128xf32>,
    %84 = arith.index_cast %51 : i32 to index
    %c0_39 = arith.constant 0 : index
    %85 = vector.load %arg12[%84, %c0_39] : memref<64x128xf32, #tpu.memory_space<vmem>>, vector<8x128xf32>
    tpu.vector_store %arg12[%84, %c0_39], %82 {strides = array<i32>} : memref<64x128xf32, #tpu.memory_space<vmem>>, vector<8x128xf32>,
    %c2_i32 = arith.constant 2 : i32
    %c1_i32_40 = arith.constant 1 : i32
    %86 = arith.muli %c2_i32, %c1_i32_40 : i32
    %c0_i32_41 = arith.constant 0 : i32
    %87 = arith.addi %c0_i32_41, %86 : i32
    %c8_i32_42 = arith.constant 8 : i32
    %88 = arith.muli %87, %c8_i32_42 : i32
    %89 = tpu.assume_multiple %88, 8 : i32
    %c0_43 = arith.constant 0 : index
    %c0_44 = arith.constant 0 : index
    %90 = vector.load %arg13[%c0_43, %c0_44] : memref<8x128xf32, #tpu.memory_space<vmem>>, vector<8x128xf32>
    %91 = arith.index_cast %89 : i32 to index
    %c0_45 = arith.constant 0 : index
    %92 = vector.load %arg11[%91, %c0_45] : memref<64x384xf32, #tpu.memory_space<vmem>>, vector<8x384xf32>
    %c0_46 = arith.constant 0 : index
    %c0_47 = arith.constant 0 : index
    %93 = vector.load %arg5[%c0_46, %c0_47] : memref<128x384xf32, #tpu.memory_space<vmem>>, vector<128x384xf32>
    %cst_48 = arith.constant dense<0.000000e+00> : vector<8x384xf32>
    %94 = tpu.matmul %90, %93, %cst_48 {dimension_numbers = #tpu.dot_dimension_numbers<[1], [0], [0], [1], [0, 0, 1, 1], [], []>} : vector<8x128xf32>, vector<128x384xf32>, vector<8x384xf32> -> vector<8x384xf32>
    %95 = vector.extract_strided_slice %92 {offsets = [0, 0], sizes = [8, 128], strides = [1, 1]} : vector<8x384xf32> to vector<8x128xf32>
    %96 = vector.extract_strided_slice %94 {offsets = [0, 0], sizes = [8, 128], strides = [1, 1]} : vector<8x384xf32> to vector<8x128xf32>
    %97 = arith.addf %95, %96 : vector<8x128xf32>
    %98 = arith.negf %97 : vector<8x128xf32>
    %99 = math.exp %98 : vector<8x128xf32>
    %cst_49 = arith.constant 1.000000e+00 : f32
    %100 = vector.broadcast %cst_49 : f32 to vector<8x128xf32>
    %101 = arith.addf %100, %99 : vector<8x128xf32>
    %102 = arith.divf %100, %101 : vector<8x128xf32>
    %103 = vector.extract_strided_slice %92 {offsets = [0, 128], sizes = [8, 128], strides = [1, 1]} : vector<8x384xf32> to vector<8x128xf32>
    %104 = vector.extract_strided_slice %94 {offsets = [0, 128], sizes = [8, 128], strides = [1, 1]} : vector<8x384xf32> to vector<8x128xf32>
    %105 = arith.addf %103, %104 : vector<8x128xf32>
    %106 = arith.negf %105 : vector<8x128xf32>
    %107 = math.exp %106 : vector<8x128xf32>
    %cst_50 = arith.constant 1.000000e+00 : f32
    %108 = vector.broadcast %cst_50 : f32 to vector<8x128xf32>
    %109 = arith.addf %108, %107 : vector<8x128xf32>
    %110 = arith.divf %108, %109 : vector<8x128xf32>
    %111 = vector.extract_strided_slice %92 {offsets = [0, 256], sizes = [8, 128], strides = [1, 1]} : vector<8x384xf32> to vector<8x128xf32>
    %112 = vector.extract_strided_slice %94 {offsets = [0, 256], sizes = [8, 128], strides = [1, 1]} : vector<8x384xf32> to vector<8x128xf32>
    %c0_51 = arith.constant 0 : index
    %c0_52 = arith.constant 0 : index
    %113 = vector.load %arg6[%c0_51, %c0_52] : memref<8x128xf32, #tpu.memory_space<vmem>>, vector<8x128xf32>
    %114 = arith.addf %112, %113 : vector<8x128xf32>
    %115 = arith.mulf %102, %114 : vector<8x128xf32>
    %116 = arith.addf %111, %115 : vector<8x128xf32>
    %117 = math.tanh %116 : vector<8x128xf32>
    %118 = arith.subf %90, %117 : vector<8x128xf32>
    %119 = arith.mulf %110, %118 : vector<8x128xf32>
    %120 = arith.addf %117, %119 : vector<8x128xf32>
    %c0_53 = arith.constant 0 : index
    %c0_54 = arith.constant 0 : index
    %121 = vector.load %arg13[%c0_53, %c0_54] : memref<8x128xf32, #tpu.memory_space<vmem>>, vector<8x128xf32>
    tpu.vector_store %arg13[%c0_53, %c0_54], %120 {strides = array<i32>} : memref<8x128xf32, #tpu.memory_space<vmem>>, vector<8x128xf32>,
    %122 = arith.index_cast %89 : i32 to index
    %c0_55 = arith.constant 0 : index
    %123 = vector.load %arg12[%122, %c0_55] : memref<64x128xf32, #tpu.memory_space<vmem>>, vector<8x128xf32>
    tpu.vector_store %arg12[%122, %c0_55], %120 {strides = array<i32>} : memref<64x128xf32, #tpu.memory_space<vmem>>, vector<8x128xf32>,
    %c3_i32 = arith.constant 3 : i32
    %c1_i32_56 = arith.constant 1 : i32
    %124 = arith.muli %c3_i32, %c1_i32_56 : i32
    %c0_i32_57 = arith.constant 0 : i32
    %125 = arith.addi %c0_i32_57, %124 : i32
    %c8_i32_58 = arith.constant 8 : i32
    %126 = arith.muli %125, %c8_i32_58 : i32
    %127 = tpu.assume_multiple %126, 8 : i32
    %c0_59 = arith.constant 0 : index
    %c0_60 = arith.constant 0 : index
    %128 = vector.load %arg13[%c0_59, %c0_60] : memref<8x128xf32, #tpu.memory_space<vmem>>, vector<8x128xf32>
    %129 = arith.index_cast %127 : i32 to index
    %c0_61 = arith.constant 0 : index
    %130 = vector.load %arg11[%129, %c0_61] : memref<64x384xf32, #tpu.memory_space<vmem>>, vector<8x384xf32>
    %c0_62 = arith.constant 0 : index
    %c0_63 = arith.constant 0 : index
    %131 = vector.load %arg5[%c0_62, %c0_63] : memref<128x384xf32, #tpu.memory_space<vmem>>, vector<128x384xf32>
    %cst_64 = arith.constant dense<0.000000e+00> : vector<8x384xf32>
    %132 = tpu.matmul %128, %131, %cst_64 {dimension_numbers = #tpu.dot_dimension_numbers<[1], [0], [0], [1], [0, 0, 1, 1], [], []>} : vector<8x128xf32>, vector<128x384xf32>, vector<8x384xf32> -> vector<8x384xf32>
    %133 = vector.extract_strided_slice %130 {offsets = [0, 0], sizes = [8, 128], strides = [1, 1]} : vector<8x384xf32> to vector<8x128xf32>
    %134 = vector.extract_strided_slice %132 {offsets = [0, 0], sizes = [8, 128], strides = [1, 1]} : vector<8x384xf32> to vector<8x128xf32>
    %135 = arith.addf %133, %134 : vector<8x128xf32>
    %136 = arith.negf %135 : vector<8x128xf32>
    %137 = math.exp %136 : vector<8x128xf32>
    %cst_65 = arith.constant 1.000000e+00 : f32
    %138 = vector.broadcast %cst_65 : f32 to vector<8x128xf32>
    %139 = arith.addf %138, %137 : vector<8x128xf32>
    %140 = arith.divf %138, %139 : vector<8x128xf32>
    %141 = vector.extract_strided_slice %130 {offsets = [0, 128], sizes = [8, 128], strides = [1, 1]} : vector<8x384xf32> to vector<8x128xf32>
    %142 = vector.extract_strided_slice %132 {offsets = [0, 128], sizes = [8, 128], strides = [1, 1]} : vector<8x384xf32> to vector<8x128xf32>
    %143 = arith.addf %141, %142 : vector<8x128xf32>
    %144 = arith.negf %143 : vector<8x128xf32>
    %145 = math.exp %144 : vector<8x128xf32>
    %cst_66 = arith.constant 1.000000e+00 : f32
    %146 = vector.broadcast %cst_66 : f32 to vector<8x128xf32>
    %147 = arith.addf %146, %145 : vector<8x128xf32>
    %148 = arith.divf %146, %147 : vector<8x128xf32>
    %149 = vector.extract_strided_slice %130 {offsets = [0, 256], sizes = [8, 128], strides = [1, 1]} : vector<8x384xf32> to vector<8x128xf32>
    %150 = vector.extract_strided_slice %132 {offsets = [0, 256], sizes = [8, 128], strides = [1, 1]} : vector<8x384xf32> to vector<8x128xf32>
    %c0_67 = arith.constant 0 : index
    %c0_68 = arith.constant 0 : index
    %151 = vector.load %arg6[%c0_67, %c0_68] : memref<8x128xf32, #tpu.memory_space<vmem>>, vector<8x128xf32>
    %152 = arith.addf %150, %151 : vector<8x128xf32>
    %153 = arith.mulf %140, %152 : vector<8x128xf32>
    %154 = arith.addf %149, %153 : vector<8x128xf32>
    %155 = math.tanh %154 : vector<8x128xf32>
    %156 = arith.subf %128, %155 : vector<8x128xf32>
    %157 = arith.mulf %148, %156 : vector<8x128xf32>
    %158 = arith.addf %155, %157 : vector<8x128xf32>
    %c0_69 = arith.constant 0 : index
    %c0_70 = arith.constant 0 : index
    %159 = vector.load %arg13[%c0_69, %c0_70] : memref<8x128xf32, #tpu.memory_space<vmem>>, vector<8x128xf32>
    tpu.vector_store %arg13[%c0_69, %c0_70], %158 {strides = array<i32>} : memref<8x128xf32, #tpu.memory_space<vmem>>, vector<8x128xf32>,
    %160 = arith.index_cast %127 : i32 to index
    %c0_71 = arith.constant 0 : index
    %161 = vector.load %arg12[%160, %c0_71] : memref<64x128xf32, #tpu.memory_space<vmem>>, vector<8x128xf32>
    tpu.vector_store %arg12[%160, %c0_71], %158 {strides = array<i32>} : memref<64x128xf32, #tpu.memory_space<vmem>>, vector<8x128xf32>,
    %c4_i32 = arith.constant 4 : i32
    %c1_i32_72 = arith.constant 1 : i32
    %162 = arith.muli %c4_i32, %c1_i32_72 : i32
    %c0_i32_73 = arith.constant 0 : i32
    %163 = arith.addi %c0_i32_73, %162 : i32
    %c8_i32_74 = arith.constant 8 : i32
    %164 = arith.muli %163, %c8_i32_74 : i32
    %165 = tpu.assume_multiple %164, 8 : i32
    %c0_75 = arith.constant 0 : index
    %c0_76 = arith.constant 0 : index
    %166 = vector.load %arg13[%c0_75, %c0_76] : memref<8x128xf32, #tpu.memory_space<vmem>>, vector<8x128xf32>
    %167 = arith.index_cast %165 : i32 to index
    %c0_77 = arith.constant 0 : index
    %168 = vector.load %arg11[%167, %c0_77] : memref<64x384xf32, #tpu.memory_space<vmem>>, vector<8x384xf32>
    %c0_78 = arith.constant 0 : index
    %c0_79 = arith.constant 0 : index
    %169 = vector.load %arg5[%c0_78, %c0_79] : memref<128x384xf32, #tpu.memory_space<vmem>>, vector<128x384xf32>
    %cst_80 = arith.constant dense<0.000000e+00> : vector<8x384xf32>
    %170 = tpu.matmul %166, %169, %cst_80 {dimension_numbers = #tpu.dot_dimension_numbers<[1], [0], [0], [1], [0, 0, 1, 1], [], []>} : vector<8x128xf32>, vector<128x384xf32>, vector<8x384xf32> -> vector<8x384xf32>
    %171 = vector.extract_strided_slice %168 {offsets = [0, 0], sizes = [8, 128], strides = [1, 1]} : vector<8x384xf32> to vector<8x128xf32>
    %172 = vector.extract_strided_slice %170 {offsets = [0, 0], sizes = [8, 128], strides = [1, 1]} : vector<8x384xf32> to vector<8x128xf32>
    %173 = arith.addf %171, %172 : vector<8x128xf32>
    %174 = arith.negf %173 : vector<8x128xf32>
    %175 = math.exp %174 : vector<8x128xf32>
    %cst_81 = arith.constant 1.000000e+00 : f32
    %176 = vector.broadcast %cst_81 : f32 to vector<8x128xf32>
    %177 = arith.addf %176, %175 : vector<8x128xf32>
    %178 = arith.divf %176, %177 : vector<8x128xf32>
    %179 = vector.extract_strided_slice %168 {offsets = [0, 128], sizes = [8, 128], strides = [1, 1]} : vector<8x384xf32> to vector<8x128xf32>
    %180 = vector.extract_strided_slice %170 {offsets = [0, 128], sizes = [8, 128], strides = [1, 1]} : vector<8x384xf32> to vector<8x128xf32>
    %181 = arith.addf %179, %180 : vector<8x128xf32>
    %182 = arith.negf %181 : vector<8x128xf32>
    %183 = math.exp %182 : vector<8x128xf32>
    %cst_82 = arith.constant 1.000000e+00 : f32
    %184 = vector.broadcast %cst_82 : f32 to vector<8x128xf32>
    %185 = arith.addf %184, %183 : vector<8x128xf32>
    %186 = arith.divf %184, %185 : vector<8x128xf32>
    %187 = vector.extract_strided_slice %168 {offsets = [0, 256], sizes = [8, 128], strides = [1, 1]} : vector<8x384xf32> to vector<8x128xf32>
    %188 = vector.extract_strided_slice %170 {offsets = [0, 256], sizes = [8, 128], strides = [1, 1]} : vector<8x384xf32> to vector<8x128xf32>
    %c0_83 = arith.constant 0 : index
    %c0_84 = arith.constant 0 : index
    %189 = vector.load %arg6[%c0_83, %c0_84] : memref<8x128xf32, #tpu.memory_space<vmem>>, vector<8x128xf32>
    %190 = arith.addf %188, %189 : vector<8x128xf32>
    %191 = arith.mulf %178, %190 : vector<8x128xf32>
    %192 = arith.addf %187, %191 : vector<8x128xf32>
    %193 = math.tanh %192 : vector<8x128xf32>
    %194 = arith.subf %166, %193 : vector<8x128xf32>
    %195 = arith.mulf %186, %194 : vector<8x128xf32>
    %196 = arith.addf %193, %195 : vector<8x128xf32>
    %c0_85 = arith.constant 0 : index
    %c0_86 = arith.constant 0 : index
    %197 = vector.load %arg13[%c0_85, %c0_86] : memref<8x128xf32, #tpu.memory_space<vmem>>, vector<8x128xf32>
    tpu.vector_store %arg13[%c0_85, %c0_86], %196 {strides = array<i32>} : memref<8x128xf32, #tpu.memory_space<vmem>>, vector<8x128xf32>,
    %198 = arith.index_cast %165 : i32 to index
    %c0_87 = arith.constant 0 : index
    %199 = vector.load %arg12[%198, %c0_87] : memref<64x128xf32, #tpu.memory_space<vmem>>, vector<8x128xf32>
    tpu.vector_store %arg12[%198, %c0_87], %196 {strides = array<i32>} : memref<64x128xf32, #tpu.memory_space<vmem>>, vector<8x128xf32>,
    %c5_i32 = arith.constant 5 : i32
    %c1_i32_88 = arith.constant 1 : i32
    %200 = arith.muli %c5_i32, %c1_i32_88 : i32
    %c0_i32_89 = arith.constant 0 : i32
    %201 = arith.addi %c0_i32_89, %200 : i32
    %c8_i32_90 = arith.constant 8 : i32
    %202 = arith.muli %201, %c8_i32_90 : i32
    %203 = tpu.assume_multiple %202, 8 : i32
    %c0_91 = arith.constant 0 : index
    %c0_92 = arith.constant 0 : index
    %204 = vector.load %arg13[%c0_91, %c0_92] : memref<8x128xf32, #tpu.memory_space<vmem>>, vector<8x128xf32>
    %205 = arith.index_cast %203 : i32 to index
    %c0_93 = arith.constant 0 : index
    %206 = vector.load %arg11[%205, %c0_93] : memref<64x384xf32, #tpu.memory_space<vmem>>, vector<8x384xf32>
    %c0_94 = arith.constant 0 : index
    %c0_95 = arith.constant 0 : index
    %207 = vector.load %arg5[%c0_94, %c0_95] : memref<128x384xf32, #tpu.memory_space<vmem>>, vector<128x384xf32>
    %cst_96 = arith.constant dense<0.000000e+00> : vector<8x384xf32>
    %208 = tpu.matmul %204, %207, %cst_96 {dimension_numbers = #tpu.dot_dimension_numbers<[1], [0], [0], [1], [0, 0, 1, 1], [], []>} : vector<8x128xf32>, vector<128x384xf32>, vector<8x384xf32> -> vector<8x384xf32>
    %209 = vector.extract_strided_slice %206 {offsets = [0, 0], sizes = [8, 128], strides = [1, 1]} : vector<8x384xf32> to vector<8x128xf32>
    %210 = vector.extract_strided_slice %208 {offsets = [0, 0], sizes = [8, 128], strides = [1, 1]} : vector<8x384xf32> to vector<8x128xf32>
    %211 = arith.addf %209, %210 : vector<8x128xf32>
    %212 = arith.negf %211 : vector<8x128xf32>
    %213 = math.exp %212 : vector<8x128xf32>
    %cst_97 = arith.constant 1.000000e+00 : f32
    %214 = vector.broadcast %cst_97 : f32 to vector<8x128xf32>
    %215 = arith.addf %214, %213 : vector<8x128xf32>
    %216 = arith.divf %214, %215 : vector<8x128xf32>
    %217 = vector.extract_strided_slice %206 {offsets = [0, 128], sizes = [8, 128], strides = [1, 1]} : vector<8x384xf32> to vector<8x128xf32>
    %218 = vector.extract_strided_slice %208 {offsets = [0, 128], sizes = [8, 128], strides = [1, 1]} : vector<8x384xf32> to vector<8x128xf32>
    %219 = arith.addf %217, %218 : vector<8x128xf32>
    %220 = arith.negf %219 : vector<8x128xf32>
    %221 = math.exp %220 : vector<8x128xf32>
    %cst_98 = arith.constant 1.000000e+00 : f32
    %222 = vector.broadcast %cst_98 : f32 to vector<8x128xf32>
    %223 = arith.addf %222, %221 : vector<8x128xf32>
    %224 = arith.divf %222, %223 : vector<8x128xf32>
    %225 = vector.extract_strided_slice %206 {offsets = [0, 256], sizes = [8, 128], strides = [1, 1]} : vector<8x384xf32> to vector<8x128xf32>
    %226 = vector.extract_strided_slice %208 {offsets = [0, 256], sizes = [8, 128], strides = [1, 1]} : vector<8x384xf32> to vector<8x128xf32>
    %c0_99 = arith.constant 0 : index
    %c0_100 = arith.constant 0 : index
    %227 = vector.load %arg6[%c0_99, %c0_100] : memref<8x128xf32, #tpu.memory_space<vmem>>, vector<8x128xf32>
    %228 = arith.addf %226, %227 : vector<8x128xf32>
    %229 = arith.mulf %216, %228 : vector<8x128xf32>
    %230 = arith.addf %225, %229 : vector<8x128xf32>
    %231 = math.tanh %230 : vector<8x128xf32>
    %232 = arith.subf %204, %231 : vector<8x128xf32>
    %233 = arith.mulf %224, %232 : vector<8x128xf32>
    %234 = arith.addf %231, %233 : vector<8x128xf32>
    %c0_101 = arith.constant 0 : index
    %c0_102 = arith.constant 0 : index
    %235 = vector.load %arg13[%c0_101, %c0_102] : memref<8x128xf32, #tpu.memory_space<vmem>>, vector<8x128xf32>
    tpu.vector_store %arg13[%c0_101, %c0_102], %234 {strides = array<i32>} : memref<8x128xf32, #tpu.memory_space<vmem>>, vector<8x128xf32>,
    %236 = arith.index_cast %203 : i32 to index
    %c0_103 = arith.constant 0 : index
    %237 = vector.load %arg12[%236, %c0_103] : memref<64x128xf32, #tpu.memory_space<vmem>>, vector<8x128xf32>
    tpu.vector_store %arg12[%236, %c0_103], %234 {strides = array<i32>} : memref<64x128xf32, #tpu.memory_space<vmem>>, vector<8x128xf32>,
    %c6_i32 = arith.constant 6 : i32
    %c1_i32_104 = arith.constant 1 : i32
    %238 = arith.muli %c6_i32, %c1_i32_104 : i32
    %c0_i32_105 = arith.constant 0 : i32
    %239 = arith.addi %c0_i32_105, %238 : i32
    %c8_i32_106 = arith.constant 8 : i32
    %240 = arith.muli %239, %c8_i32_106 : i32
    %241 = tpu.assume_multiple %240, 8 : i32
    %c0_107 = arith.constant 0 : index
    %c0_108 = arith.constant 0 : index
    %242 = vector.load %arg13[%c0_107, %c0_108] : memref<8x128xf32, #tpu.memory_space<vmem>>, vector<8x128xf32>
    %243 = arith.index_cast %241 : i32 to index
    %c0_109 = arith.constant 0 : index
    %244 = vector.load %arg11[%243, %c0_109] : memref<64x384xf32, #tpu.memory_space<vmem>>, vector<8x384xf32>
    %c0_110 = arith.constant 0 : index
    %c0_111 = arith.constant 0 : index
    %245 = vector.load %arg5[%c0_110, %c0_111] : memref<128x384xf32, #tpu.memory_space<vmem>>, vector<128x384xf32>
    %cst_112 = arith.constant dense<0.000000e+00> : vector<8x384xf32>
    %246 = tpu.matmul %242, %245, %cst_112 {dimension_numbers = #tpu.dot_dimension_numbers<[1], [0], [0], [1], [0, 0, 1, 1], [], []>} : vector<8x128xf32>, vector<128x384xf32>, vector<8x384xf32> -> vector<8x384xf32>
    %247 = vector.extract_strided_slice %244 {offsets = [0, 0], sizes = [8, 128], strides = [1, 1]} : vector<8x384xf32> to vector<8x128xf32>
    %248 = vector.extract_strided_slice %246 {offsets = [0, 0], sizes = [8, 128], strides = [1, 1]} : vector<8x384xf32> to vector<8x128xf32>
    %249 = arith.addf %247, %248 : vector<8x128xf32>
    %250 = arith.negf %249 : vector<8x128xf32>
    %251 = math.exp %250 : vector<8x128xf32>
    %cst_113 = arith.constant 1.000000e+00 : f32
    %252 = vector.broadcast %cst_113 : f32 to vector<8x128xf32>
    %253 = arith.addf %252, %251 : vector<8x128xf32>
    %254 = arith.divf %252, %253 : vector<8x128xf32>
    %255 = vector.extract_strided_slice %244 {offsets = [0, 128], sizes = [8, 128], strides = [1, 1]} : vector<8x384xf32> to vector<8x128xf32>
    %256 = vector.extract_strided_slice %246 {offsets = [0, 128], sizes = [8, 128], strides = [1, 1]} : vector<8x384xf32> to vector<8x128xf32>
    %257 = arith.addf %255, %256 : vector<8x128xf32>
    %258 = arith.negf %257 : vector<8x128xf32>
    %259 = math.exp %258 : vector<8x128xf32>
    %cst_114 = arith.constant 1.000000e+00 : f32
    %260 = vector.broadcast %cst_114 : f32 to vector<8x128xf32>
    %261 = arith.addf %260, %259 : vector<8x128xf32>
    %262 = arith.divf %260, %261 : vector<8x128xf32>
    %263 = vector.extract_strided_slice %244 {offsets = [0, 256], sizes = [8, 128], strides = [1, 1]} : vector<8x384xf32> to vector<8x128xf32>
    %264 = vector.extract_strided_slice %246 {offsets = [0, 256], sizes = [8, 128], strides = [1, 1]} : vector<8x384xf32> to vector<8x128xf32>
    %c0_115 = arith.constant 0 : index
    %c0_116 = arith.constant 0 : index
    %265 = vector.load %arg6[%c0_115, %c0_116] : memref<8x128xf32, #tpu.memory_space<vmem>>, vector<8x128xf32>
    %266 = arith.addf %264, %265 : vector<8x128xf32>
    %267 = arith.mulf %254, %266 : vector<8x128xf32>
    %268 = arith.addf %263, %267 : vector<8x128xf32>
    %269 = math.tanh %268 : vector<8x128xf32>
    %270 = arith.subf %242, %269 : vector<8x128xf32>
    %271 = arith.mulf %262, %270 : vector<8x128xf32>
    %272 = arith.addf %269, %271 : vector<8x128xf32>
    %c0_117 = arith.constant 0 : index
    %c0_118 = arith.constant 0 : index
    %273 = vector.load %arg13[%c0_117, %c0_118] : memref<8x128xf32, #tpu.memory_space<vmem>>, vector<8x128xf32>
    tpu.vector_store %arg13[%c0_117, %c0_118], %272 {strides = array<i32>} : memref<8x128xf32, #tpu.memory_space<vmem>>, vector<8x128xf32>,
    %274 = arith.index_cast %241 : i32 to index
    %c0_119 = arith.constant 0 : index
    %275 = vector.load %arg12[%274, %c0_119] : memref<64x128xf32, #tpu.memory_space<vmem>>, vector<8x128xf32>
    tpu.vector_store %arg12[%274, %c0_119], %272 {strides = array<i32>} : memref<64x128xf32, #tpu.memory_space<vmem>>, vector<8x128xf32>,
    %c7_i32 = arith.constant 7 : i32
    %c1_i32_120 = arith.constant 1 : i32
    %276 = arith.muli %c7_i32, %c1_i32_120 : i32
    %c0_i32_121 = arith.constant 0 : i32
    %277 = arith.addi %c0_i32_121, %276 : i32
    %c8_i32_122 = arith.constant 8 : i32
    %278 = arith.muli %277, %c8_i32_122 : i32
    %279 = tpu.assume_multiple %278, 8 : i32
    %c0_123 = arith.constant 0 : index
    %c0_124 = arith.constant 0 : index
    %280 = vector.load %arg13[%c0_123, %c0_124] : memref<8x128xf32, #tpu.memory_space<vmem>>, vector<8x128xf32>
    %281 = arith.index_cast %279 : i32 to index
    %c0_125 = arith.constant 0 : index
    %282 = vector.load %arg11[%281, %c0_125] : memref<64x384xf32, #tpu.memory_space<vmem>>, vector<8x384xf32>
    %c0_126 = arith.constant 0 : index
    %c0_127 = arith.constant 0 : index
    %283 = vector.load %arg5[%c0_126, %c0_127] : memref<128x384xf32, #tpu.memory_space<vmem>>, vector<128x384xf32>
    %cst_128 = arith.constant dense<0.000000e+00> : vector<8x384xf32>
    %284 = tpu.matmul %280, %283, %cst_128 {dimension_numbers = #tpu.dot_dimension_numbers<[1], [0], [0], [1], [0, 0, 1, 1], [], []>} : vector<8x128xf32>, vector<128x384xf32>, vector<8x384xf32> -> vector<8x384xf32>
    %285 = vector.extract_strided_slice %282 {offsets = [0, 0], sizes = [8, 128], strides = [1, 1]} : vector<8x384xf32> to vector<8x128xf32>
    %286 = vector.extract_strided_slice %284 {offsets = [0, 0], sizes = [8, 128], strides = [1, 1]} : vector<8x384xf32> to vector<8x128xf32>
    %287 = arith.addf %285, %286 : vector<8x128xf32>
    %288 = arith.negf %287 : vector<8x128xf32>
    %289 = math.exp %288 : vector<8x128xf32>
    %cst_129 = arith.constant 1.000000e+00 : f32
    %290 = vector.broadcast %cst_129 : f32 to vector<8x128xf32>
    %291 = arith.addf %290, %289 : vector<8x128xf32>
    %292 = arith.divf %290, %291 : vector<8x128xf32>
    %293 = vector.extract_strided_slice %282 {offsets = [0, 128], sizes = [8, 128], strides = [1, 1]} : vector<8x384xf32> to vector<8x128xf32>
    %294 = vector.extract_strided_slice %284 {offsets = [0, 128], sizes = [8, 128], strides = [1, 1]} : vector<8x384xf32> to vector<8x128xf32>
    %295 = arith.addf %293, %294 : vector<8x128xf32>
    %296 = arith.negf %295 : vector<8x128xf32>
    %297 = math.exp %296 : vector<8x128xf32>
    %cst_130 = arith.constant 1.000000e+00 : f32
    %298 = vector.broadcast %cst_130 : f32 to vector<8x128xf32>
    %299 = arith.addf %298, %297 : vector<8x128xf32>
    %300 = arith.divf %298, %299 : vector<8x128xf32>
    %301 = vector.extract_strided_slice %282 {offsets = [0, 256], sizes = [8, 128], strides = [1, 1]} : vector<8x384xf32> to vector<8x128xf32>
    %302 = vector.extract_strided_slice %284 {offsets = [0, 256], sizes = [8, 128], strides = [1, 1]} : vector<8x384xf32> to vector<8x128xf32>
    %c0_131 = arith.constant 0 : index
    %c0_132 = arith.constant 0 : index
    %303 = vector.load %arg6[%c0_131, %c0_132] : memref<8x128xf32, #tpu.memory_space<vmem>>, vector<8x128xf32>
    %304 = arith.addf %302, %303 : vector<8x128xf32>
    %305 = arith.mulf %292, %304 : vector<8x128xf32>
    %306 = arith.addf %301, %305 : vector<8x128xf32>
    %307 = math.tanh %306 : vector<8x128xf32>
    %308 = arith.subf %280, %307 : vector<8x128xf32>
    %309 = arith.mulf %300, %308 : vector<8x128xf32>
    %310 = arith.addf %307, %309 : vector<8x128xf32>
    %c0_133 = arith.constant 0 : index
    %c0_134 = arith.constant 0 : index
    %311 = vector.load %arg13[%c0_133, %c0_134] : memref<8x128xf32, #tpu.memory_space<vmem>>, vector<8x128xf32>
    tpu.vector_store %arg13[%c0_133, %c0_134], %310 {strides = array<i32>} : memref<8x128xf32, #tpu.memory_space<vmem>>, vector<8x128xf32>,
    %312 = arith.index_cast %279 : i32 to index
    %c0_135 = arith.constant 0 : index
    %313 = vector.load %arg12[%312, %c0_135] : memref<64x128xf32, #tpu.memory_space<vmem>>, vector<8x128xf32>
    tpu.vector_store %arg12[%312, %c0_135], %310 {strides = array<i32>} : memref<64x128xf32, #tpu.memory_space<vmem>>, vector<8x128xf32>,
    %c8_i32_136 = arith.constant 8 : i32
    %c0_137 = arith.constant 0 : index
    %c0_138 = arith.constant 0 : index
    %314 = vector.load %arg12[%c0_137, %c0_138] : memref<64x128xf32, #tpu.memory_space<vmem>>, vector<64x128xf32>
    %c0_139 = arith.constant 0 : index
    %c0_140 = arith.constant 0 : index
    %315 = vector.load %arg7[%c0_139, %c0_140] : memref<128x128xf32, #tpu.memory_space<vmem>>, vector<128x128xf32>
    %cst_141 = arith.constant dense<0.000000e+00> : vector<64x128xf32>
    %316 = tpu.matmul %314, %315, %cst_141 {dimension_numbers = #tpu.dot_dimension_numbers<[1], [0], [0], [1], [0, 0, 1, 1], [], []>} : vector<64x128xf32>, vector<128x128xf32>, vector<64x128xf32> -> vector<64x128xf32>
    %c0_142 = arith.constant 0 : index
    %c0_143 = arith.constant 0 : index
    %317 = vector.load %arg8[%c0_142, %c0_143] : memref<1x128xf32, #tpu.memory_space<vmem>>, vector<1x128xf32>
    %318 = vector.broadcast %317 : vector<1x128xf32> to vector<64x128xf32>
    %319 = arith.addf %316, %318 : vector<64x128xf32>
    %c0_144 = arith.constant 0 : index
    %c0_145 = arith.constant 0 : index
    %320 = vector.load %arg9[%c0_144, %c0_145] : memref<64x128xf32, #tpu.memory_space<vmem>>, vector<64x128xf32>
    tpu.vector_store %arg9[%c0_144, %c0_145], %319 {strides = array<i32>} : memref<64x128xf32, #tpu.memory_space<vmem>>, vector<64x128xf32>,
    %c0_146 = arith.constant 0 : index
    %c0_147 = arith.constant 0 : index
    %321 = vector.load %arg13[%c0_146, %c0_147] : memref<8x128xf32, #tpu.memory_space<vmem>>, vector<8x128xf32>
    %c0_148 = arith.constant 0 : index
    %c0_149 = arith.constant 0 : index
    %322 = vector.load %arg10[%c0_148, %c0_149] : memref<8x128xf32, #tpu.memory_space<vmem>>, vector<8x128xf32>
    tpu.vector_store %arg10[%c0_148, %c0_149], %321 {strides = array<i32>} : memref<8x128xf32, #tpu.memory_space<vmem>>, vector<8x128xf32>,
    return
  }
  func.func @transform_0(%arg0: i32) -> (i32, i32) {
    %c0_i32 = arith.constant 0 : i32
    %c0_i32_0 = arith.constant 0 : i32
    return %arg0, %c0_i32 : i32, i32
  }
  func.func @transform_1(%arg0: i32) -> (i32, i32) {
    %c0_i32 = arith.constant 0 : i32
    %c0_i32_0 = arith.constant 0 : i32
    %c0_i32_1 = arith.constant 0 : i32
    return %c0_i32, %c0_i32_0 : i32, i32
  }
  func.func @transform_2(%arg0: i32) -> (i32, i32) {
    %c0_i32 = arith.constant 0 : i32
    %c0_i32_0 = arith.constant 0 : i32
    %c0_i32_1 = arith.constant 0 : i32
    return %c0_i32, %c0_i32_0 : i32, i32
  }
  func.func @transform_3(%arg0: i32) -> (i32, i32) {
    %c0_i32 = arith.constant 0 : i32
    %c0_i32_0 = arith.constant 0 : i32
    %c0_i32_1 = arith.constant 0 : i32
    return %c0_i32, %c0_i32_0 : i32, i32
  }
  func.func @transform_4(%arg0: i32) -> (i32, i32) {
    %c0_i32 = arith.constant 0 : i32
    %c0_i32_0 = arith.constant 0 : i32
    %c0_i32_1 = arith.constant 0 : i32
    return %c0_i32, %c0_i32_0 : i32, i32
  }
  func.func @transform_5(%arg0: i32) -> (i32, i32) {
    %c0_i32 = arith.constant 0 : i32
    %c0_i32_0 = arith.constant 0 : i32
    %c0_i32_1 = arith.constant 0 : i32
    return %c0_i32, %c0_i32_0 : i32, i32
  }
  func.func @transform_6(%arg0: i32) -> (i32, i32) {
    %c0_i32 = arith.constant 0 : i32
    %c0_i32_0 = arith.constant 0 : i32
    %c0_i32_1 = arith.constant 0 : i32
    return %c0_i32, %c0_i32_0 : i32, i32
  }
  func.func @transform_7(%arg0: i32) -> (i32, i32) {
    %c0_i32 = arith.constant 0 : i32
    %c0_i32_0 = arith.constant 0 : i32
    %c0_i32_1 = arith.constant 0 : i32
    return %c0_i32, %c0_i32_0 : i32, i32
  }
  func.func @transform_8(%arg0: i32) -> (i32, i32) {
    %c0_i32 = arith.constant 0 : i32
    %c0_i32_0 = arith.constant 0 : i32
    return %arg0, %c0_i32 : i32, i32
  }
  func.func @transform_9(%arg0: i32) -> (i32, i32) {
    %c0_i32 = arith.constant 0 : i32
    %c0_i32_0 = arith.constant 0 : i32
    %c0_i32_1 = arith.constant 0 : i32
    return %c0_i32, %c0_i32_0 : i32, i32
  }
}

</mosaic_0001>

<bundles_post_ra>
// kernel: tpu_custom_call.1
= control target key start
LH: loop header
LB: loop body
LE: loop exit
PB: predicated region body
PF: predicated region fallthrough
CT: control target
= control target key end

     0   :  { %15 = vsyncpa [#allocation6], 0  ;;  %s4453_s0 = inlined_call_operand.hbm [shape: f32[64,128], index: 0, kind: input, shape index: {}]   ;;  %s4454_s1 = inlined_call_operand.hbm [shape: f32[8,128], index: 1, kind: input, shape index: {}]   ;;  %s4455_s2 = inlined_call_operand.hbm [shape: f32[128,384], index: 2, kind: input, shape index: {}]   ;;  %s4456_s3 = inlined_call_operand.vmem [shape: f32[1,384], index: 3, kind: input, shape index: {}]   ;;  %s4457_s4 = inlined_call_operand.hbm [shape: f32[128,384], index: 4, kind: input, shape index: {}]   ;;  %s4458_s5 = inlined_call_operand.vmem [shape: f32[8,128], index: 5, kind: input, shape index: {}]   ;;  %s4459_s6 = inlined_call_operand.hbm [shape: f32[128,128], index: 6, kind: input, shape index: {}]   ;;  %s4460_s7 = inlined_call_operand.vmem [shape: f32[1,128], index: 7, kind: input, shape index: {}]   ;;  %s4461_s8 = inlined_call_operand.hbm [shape: f32[64,128], index: 8, kind: output, shape index: {0}]   ;;  %s4462_s9 = inlined_call_operand.hbm [shape: f32[8,128], index: 9, kind: output, shape index: {1}]  }
   0x1   :  { %16 = vsyncpa [#allocation9], 0 }
   0x2   :  { %17 = vsyncpa [#allocation12], 0 }
   0x3   :  { %18 = vsyncpa [#allocation7], 0 }
   0x4   :  { %19 = vsyncpa [#allocation16], 0  ;;  %s3776_s30 = smov [#allocation8]   ;;  %s3612_s13 = scalar_lea.hbm %s4454_s1, 128 }
   0x5   :  { %s38_s10 = sshll.u32 %s3776_s30, 4  ;;  %p3613_p0 = scmp.ne.s32.totalorder %s4454_s1, %s3612_s13  ;;  %s39_s10 = int_to_ptr.vmem [resolvable:$true] %s38_s10 }
   0x6   :  { %p3616_p1 = scmp.lt.u32.totalorder %s3612_s13, %s4454_s1 }
   0x8   :  { %p3618_p2 = pnand %p3616_p1, %p3613_p0 }
   0xa   :  { %3621 = shalt.err (!%p3618_p2)
}
   0xb   :  { %s3622_s18 = scalar_lea.vmem %s39_s10, 128  ;;  %p3627_p4 = scmp.lt.s32.totalorder %s39_s10, %s39_s10 }
   0xc   :  { %p3623_p3 = scmp.ne.s32.totalorder %s39_s10, %s3622_s18  ;;  %p3628_p5 = scmp.lt.s32.totalorder %s3622_s18, %s3622_s18 }
   0xe   :  { %p3629_p6 = por %p3628_p5, %p3627_p4 }
  0x10   :  { %p3630_p7 = pnand %p3629_p6, %p3623_p3 }
  0x12   :  { %3633 = shalt.err (!%p3630_p7)
}
  0x13   :  { %41 = dma.hbm_to_vmem [thread:$0]  %s4454_s1, 128, %s39_s10, [#allocation9]  }
  0x14   :  { %s3777_s21 = smov [#allocation11]   ;;  %s3778_s23 = smov [#allocation5]  }
  0x15   :  { %s61_s22 = sshll.u32 %s3777_s21, 4  ;;  %s25_s24 = sshll.u32 %s3778_s23, 4  ;;  %s62_s22 = int_to_ptr.vmem [resolvable:$true] %s61_s22  ;;  %s26_s24 = int_to_ptr.vmem [resolvable:$true] %s25_s24 }
  0x16   :  { %s3634_s27 = scalar_lea.hbm %s4457_s4, 6144 }
  0x17   :  { %p3635_p8 = scmp.ne.s32.totalorder %s4457_s4, %s3634_s27  ;;  %p3638_p9 = scmp.lt.u32.totalorder %s3634_s27, %s4457_s4 }
  0x19   :  { %p3640_p10 = pnand %p3638_p9, %p3635_p8 }
  0x1b   :  { %3643 = shalt.err (!%p3640_p10)
}
  0x1c   :  { %s3644_s1 = scalar_lea.vmem %s62_s22, 6144  ;;  %p3649_p12 = scmp.lt.s32.totalorder %s62_s22, %s62_s22 }
  0x1d   :  { %p3645_p11 = scmp.ne.s32.totalorder %s62_s22, %s3644_s1  ;;  %p3650_p13 = scmp.lt.s32.totalorder %s3644_s1, %s3644_s1 }
  0x1f   :  { %p3651_p0 = por %p3650_p13, %p3649_p12 }
  0x21   :  { %p3652_p1 = pnand %p3651_p0, %p3645_p11 }
  0x23   :  { %3655 = shalt.err (!%p3652_p1)
}
  0x24   :  { %s3779_s10 = smov 384   ;;  %s3780_s12 = smov 24  }
  0x25   :  { %67 = dma.hbm_to_vmem [thread:$0]  %s4457_s4, 6144, %s62_s22, [#allocation12], %s3779_s10, %s3779_s10, %s3780_s12  }
  0x26   :  { %s3656_s17 = scalar_lea.hbm %s4453_s0, 1024 }
  0x27   :  { %p3657_p2 = scmp.ne.s32.totalorder %s4453_s0, %s3656_s17  ;;  %p3660_p3 = scmp.lt.u32.totalorder %s3656_s17, %s4453_s0 }
  0x29   :  { %p3662_p4 = pnand %p3660_p3, %p3657_p2 }
  0x2b   :  { %3665 = shalt.err (!%p3662_p4)
}
  0x2c   :  { %s3666_s23 = scalar_lea.vmem %s26_s24, 1024  ;;  %p3671_p6 = scmp.lt.s32.totalorder %s26_s24, %s26_s24 }
  0x2d   :  { %p3667_p5 = scmp.ne.s32.totalorder %s26_s24, %s3666_s23  ;;  %p3672_p7 = scmp.lt.s32.totalorder %s3666_s23, %s3666_s23 }
  0x2f   :  { %p3673_p8 = por %p3672_p7, %p3671_p6 }
  0x31   :  { %p3674_p9 = pnand %p3673_p8, %p3667_p5 }
  0x33   :  { %3677 = shalt.err (!%p3674_p9)
}
  0x34   :  { %s3781_s4 = smov 128   ;;  %s3782_s22 = smov 8  }
  0x35   :  { %31 = dma.hbm_to_vmem [thread:$0]  %s4453_s0, 1024, %s26_s24, [#allocation6], %s3781_s4, %s3781_s4, %s3782_s22  }
  0x36   :  { %s3783_s27 = smov [#allocation10]   ;;  %s3784_s29 = smov [#allocation13]  }
  0x37   :  { %s47_s28 = sshll.u32 %s3783_s27, 4  ;;  %s75_s30 = sshll.u32 %s3784_s29, 4  ;;  %s48_s28 = int_to_ptr.vmem [resolvable:$true] %s47_s28  ;;  %s76_s30 = int_to_ptr.vmem [resolvable:$true] %s75_s30 }
  0x38   :  { %s3678_s13 = scalar_lea.hbm %s4455_s2, 6144 }
  0x39   :  { %p3679_p10 = scmp.ne.s32.totalorder %s4455_s2, %s3678_s13  ;;  %p3682_p11 = scmp.lt.u32.totalorder %s3678_s13, %s4455_s2 }
  0x3b   :  { %p3684_p12 = pnand %p3682_p11, %p3679_p10 }
  0x3d   :  { %3687 = shalt.err (!%p3684_p12)
}
  0x3e   :  { %s3688_s0 = scalar_lea.vmem %s48_s28, 6144  ;;  %p3693_p0 = scmp.lt.s32.totalorder %s48_s28, %s48_s28 }
  0x3f   :  { %p3689_p13 = scmp.ne.s32.totalorder %s48_s28, %s3688_s0  ;;  %p3694_p1 = scmp.lt.s32.totalorder %s3688_s0, %s3688_s0 }
  0x41   :  { %p3695_p2 = por %p3694_p1, %p3693_p0 }
  0x43   :  { %p3696_p3 = pnand %p3695_p2, %p3689_p13 }
  0x45   :  { %3699 = shalt.err (!%p3696_p3)
}
  0x46   :  { %53 = dma.hbm_to_vmem [thread:$0]  %s4455_s2, 6144, %s48_s28, [#allocation9], %s3779_s10, %s3779_s10, %s3780_s12  }
  0x47   :  { %s3700_s21 = scalar_lea.hbm %s4459_s6, 2048 }
  0x48   :  { %p3701_p4 = scmp.ne.s32.totalorder %s4459_s6, %s3700_s21  ;;  %p3704_p5 = scmp.lt.u32.totalorder %s3700_s21, %s4459_s6 }
  0x4a   :  { %p3706_p6 = pnand %p3704_p5, %p3701_p4 }
  0x4c   :  { %3709 = shalt.err (!%p3706_p6)
}
  0x4d   :  { %s3710_s29 = scalar_lea.vmem %s76_s30, 2048  ;;  %p3715_p8 = scmp.lt.s32.totalorder %s76_s30, %s76_s30 }
  0x4e   :  { %p3711_p7 = scmp.ne.s32.totalorder %s76_s30, %s3710_s29  ;;  %p3716_p9 = scmp.lt.s32.totalorder %s3710_s29, %s3710_s29 }
  0x50   :  { %p3717_p10 = por %p3716_p9, %p3715_p8 }
  0x52   :  { %p3718_p11 = pnand %p3717_p10, %p3711_p7 }
  0x54   :  { %3721 = shalt.err (!%p3718_p11)
}
  0x55   :  { %81 = dma.hbm_to_vmem [thread:$0]  %s4459_s6, 2048, %s76_s30, [#allocation12], %s3781_s4, %s3781_s4, %s3782_s22  }
  0x56   :  { %3766 = dma.done.wait [#allocation6], 1024  }
  0x57   :  { %3767 = vsyncadd [#allocation6], 4294966272 }
  0x58   :  { %3768 = dma.done.wait [#allocation9], 6272  }
  0x59   :  { %3769 = vsyncadd [#allocation9], 4294961024 }
  0x5a   :  { %3770 = dma.done.wait [#allocation12], 8192  }
  0x5b   :  { %3771 = vsyncadd [#allocation12], 4294959104  ;;  %v3785_v0 = vmov 0.0   ;;  %v114_v1 = vld [vmem:[#allocation10 + $0x8] sm:$0xff]  ;;  %v117_v2 = vld [vmem:[#allocation10 + $0x20] sm:$0xff]  ;;  %vm3787_vm0 = vmmov 0  }
  0x5c   :  { %242 = vmatprep.mubr.f32.mxu1 %v3785_v0  ;;  %539 = vmatprep.mubr.f32.mxu0 %v3785_v0  ;;  %v113_v3 = vld [vmem:[#allocation10] sm:$0xff]  ;;  %v2942_v4 = vpack.c.bf16 %v117_v2, %v114_v1  ;;  %v116_v5 = vld [vmem:[#allocation10 + $0x18] sm:$0xff]  ;;  %v428_v6 = vld [vmem:[#allocation11 + $0x8] sm:$0xff] }
  0x5d   :  { %v431_v7 = vld [vmem:[#allocation11 + $0x20] sm:$0xff]  ;;  %v2944_v8 = vpack.c.bf16 %v116_v5, %v113_v3  ;;  %v430_v11 = vld [vmem:[#allocation11 + $0x18] sm:$0xff]  ;;  %v123_v14 = vld [vmem:[#allocation10 + $0x50] sm:$0xff] }
  0x5e   :  { %v3914_v9 = vpack.c.bf16 %v431_v7, %v428_v6  ;;  %v427_v10 = vld [vmem:[#allocation11] sm:$0xff]  ;;  %v120_v12 = vld [vmem:[#allocation10 + $0x38] sm:$0xff]  ;;  %2943 = vmatprep.subr.bf16.mxu1 %v2942_v4  ;;  %v119_v15 = vld [vmem:[#allocation10 + $0x30] sm:$0xff] }
  0x5f   :  { %v3916_v13 = vpack.c.bf16 %v430_v11, %v427_v10  ;;  %v122_v16 = vld [vmem:[#allocation10 + $0x48] sm:$0xff]  ;;  %2945 = vmatpush1.bf16.msra.mxu1 %v2944_v8  ;;  %v2946_v17 = vpack.c.bf16 %v123_v14, %v120_v12  ;;  %v434_v19 = vld [vmem:[#allocation11 + $0x38] sm:$0xff]  ;;  %v437_v20 = vld [vmem:[#allocation11 + $0x50] sm:$0xff] }
  0x60   :  { %3007 = vmatprep.subr.bf16.mxu0 %v3914_v9  ;;  %v2948_v18 = vpack.c.bf16 %v122_v16, %v119_v15  ;;  %v433_v21 = vld [vmem:[#allocation11 + $0x30] sm:$0xff]  ;;  %v3920_v22 = vpack.c.bf16 %v437_v20, %v434_v19  ;;  %v436_v23 = vld [vmem:[#allocation11 + $0x48] sm:$0xff]  ;;  %v129_v25 = vld [vmem:[#allocation10 + $0x80] sm:$0xff] }
  0x61   :  { %3009 = vmatpush1.bf16.msra.mxu0 %v3916_v13  ;;  %v126_v24 = vld [vmem:[#allocation10 + $0x68] sm:$0xff]  ;;  %2947 = vmatprep.subr.bf16.mxu1 %v2946_v17  ;;  %v3922_v26 = vpack.c.bf16 %v436_v23, %v433_v21  ;;  %v125_v28 = vld [vmem:[#allocation10 + $0x60] sm:$0xff]  ;;  %v128_v29 = vld [vmem:[#allocation10 + $0x78] sm:$0xff] }
  0x62   :  { %v2950_v27 = vpack.c.bf16 %v129_v25, %v126_v24  ;;  %v440_v30 = vld [vmem:[#allocation11 + $0x68] sm:$0xff]  ;;  %3011 = vmatprep.subr.bf16.mxu0 %v3920_v22  ;;  %v443_v31 = vld [vmem:[#allocation11 + $0x80] sm:$0xff]  ;;  %v442_v33 = vld [vmem:[#allocation11 + $0x78] sm:$0xff]  ;;  %v2952_v34 = vpack.c.bf16 %v128_v29, %v125_v28 }
  0x63   :  { %v439_v32 = vld [vmem:[#allocation11 + $0x60] sm:$0xff]  ;;  %2949 = vmatpush1.bf16.msra.mxu1 %v2948_v18  ;;  %v3925_v35 = vpack.c.bf16 %v443_v31, %v440_v30  ;;  %v132_v36 = vld [vmem:[#allocation10 + $0x98] sm:$0xff]  ;;  %v135_v37 = vld [vmem:[#allocation10 + $0xb0] sm:$0xff] }
  0x64   :  { %v131_v38 = vld [vmem:[#allocation10 + $0x90] sm:$0xff]  ;;  %2951 = vmatprep.subr.bf16.mxu1 %v2950_v27  ;;  %v3928_v39 = vpack.c.bf16 %v442_v33, %v439_v32  ;;  %v2954_v40 = vpack.c.bf16 %v135_v37, %v132_v36  ;;  %v134_v41 = vld [vmem:[#allocation10 + $0xa8] sm:$0xff]  ;;  %v446_v42 = vld [vmem:[#allocation11 + $0x98] sm:$0xff] }
  0x65   :  { %3013 = vmatpush1.bf16.msra.mxu0 %v3922_v26  ;;  %v449_v43 = vld [vmem:[#allocation11 + $0xb0] sm:$0xff]  ;;  %v448_v46 = vld [vmem:[#allocation11 + $0xa8] sm:$0xff]  ;;  %v141_v48 = vld [vmem:[#allocation10 + $0xe0] sm:$0xff]  ;;  %v2956_v49 = vpack.c.bf16 %v134_v41, %v131_v38 }
  0x66   :  { %3015 = vmatprep.subr.bf16.mxu0 %v3925_v35  ;;  %v3931_v44 = vpack.c.bf16 %v449_v43, %v446_v42  ;;  %v445_v45 = vld [vmem:[#allocation11 + $0x90] sm:$0xff]  ;;  %v138_v47 = vld [vmem:[#allocation10 + $0xc8] sm:$0xff]  ;;  %v455_v51 = vld [vmem:[#allocation11 + $0xe0] sm:$0xff] }
  0x67   :  { %2953 = vmatpush1.bf16.msra.mxu1 %v2952_v34  ;;  %v452_v50 = vld [vmem:[#allocation11 + $0xc8] sm:$0xff]  ;;  %v3934_v52 = vpack.c.bf16 %v448_v46, %v445_v45  ;;  %v2958_v53 = vpack.c.bf16 %v141_v48, %v138_v47  ;;  %v137_v54 = vld [vmem:[#allocation10 + $0xc0] sm:$0xff]  ;;  %v140_v55 = vld [vmem:[#allocation10 + $0xd8] sm:$0xff] }
  0x68   :  { %2955 = vmatprep.subr.bf16.mxu1 %v2954_v40  ;;  %v451_v56 = vld [vmem:[#allocation11 + $0xc0] sm:$0xff]  ;;  %v3937_v57 = vpack.c.bf16 %v455_v51, %v452_v50  ;;  %v454_v58 = vld [vmem:[#allocation11 + $0xd8] sm:$0xff]  ;;  %v147_v60 = vld [vmem:[#allocation10 + $0x110] sm:$0xff]  ;;  %v2960_v63 = vpack.c.bf16 %v140_v55, %v137_v54 }
  0x69   :  { %3017 = vmatpush1.bf16.msra.mxu0 %v3928_v39  ;;  %v144_v59 = vld [vmem:[#allocation10 + $0xf8] sm:$0xff]  ;;  %v461_v62 = vld [vmem:[#allocation11 + $0x110] sm:$0xff]  ;;  %v3940_v1 = vpack.c.bf16 %v454_v58, %v451_v56  ;;  %v146_v4 = vld [vmem:[#allocation10 + $0x108] sm:$0xff] }
  0x6a   :  { %3019 = vmatprep.subr.bf16.mxu0 %v3931_v44  ;;  %v458_v61 = vld [vmem:[#allocation11 + $0xf8] sm:$0xff]  ;;  %v2962_v2 = vpack.c.bf16 %v147_v60, %v144_v59  ;;  %v143_v3 = vld [vmem:[#allocation10 + $0xf0] sm:$0xff]  ;;  %v460_v7 = vld [vmem:[#allocation11 + $0x108] sm:$0xff] }
  0x6b   :  { %2957 = vmatpush1.bf16.msra.mxu1 %v2956_v49  ;;  %v457_v5 = vld [vmem:[#allocation11 + $0xf0] sm:$0xff]  ;;  %v3943_v6 = vpack.c.bf16 %v461_v62, %v458_v61  ;;  %v150_v8 = vld [vmem:[#allocation10 + $0x128] sm:$0xff]  ;;  %v153_v10 = vld [vmem:[#allocation10 + $0x140] sm:$0xff]  ;;  %v2964_v14 = vpack.c.bf16 %v146_v4, %v143_v3 }
  0x6c   :  { %2959 = vmatprep.subr.bf16.mxu1 %v2958_v53  ;;  %v464_v11 = vld [vmem:[#allocation11 + $0x128] sm:$0xff]  ;;  %v467_v12 = vld [vmem:[#allocation11 + $0x140] sm:$0xff]  ;;  %v3946_v15 = vpack.c.bf16 %v460_v7, %v457_v5  ;;  %v2966_v16 = vpack.c.bf16 %v153_v10, %v150_v8  ;;  %v152_v18 = vld [vmem:[#allocation10 + $0x138] sm:$0xff] }
  0x6d   :  { %3021 = vmatpush1.bf16.msra.mxu0 %v3934_v52  ;;  %v149_v17 = vld [vmem:[#allocation10 + $0x120] sm:$0xff]  ;;  %v3949_v20 = vpack.c.bf16 %v467_v12, %v464_v11  ;;  %v466_v21 = vld [vmem:[#allocation11 + $0x138] sm:$0xff]  ;;  %v159_v24 = vld [vmem:[#allocation10 + $0x170] sm:$0xff] }
  0x6e   :  { %3023 = vmatprep.subr.bf16.mxu0 %v3937_v57  ;;  %v463_v19 = vld [vmem:[#allocation11 + $0x120] sm:$0xff]  ;;  %v156_v23 = vld [vmem:[#allocation10 + $0x158] sm:$0xff]  ;;  %v473_v27 = vld [vmem:[#allocation11 + $0x170] sm:$0xff]  ;;  %v2968_v28 = vpack.c.bf16 %v152_v18, %v149_v17 }
  0x6f   :  { %2961 = vmatpush1.bf16.msra.mxu1 %v2960_v63  ;;  %v470_v25 = vld [vmem:[#allocation11 + $0x158] sm:$0xff]  ;;  %v3952_v29 = vpack.c.bf16 %v466_v21, %v463_v19  ;;  %v2970_v30 = vpack.c.bf16 %v159_v24, %v156_v23  ;;  %v155_v31 = vld [vmem:[#allocation10 + $0x150] sm:$0xff]  ;;  %v158_v32 = vld [vmem:[#allocation10 + $0x168] sm:$0xff]  ;;  %v3786_v23 = vmov 0.0|0.0  }
  0x70   :  { %2963 = vmatprep.subr.bf16.mxu1 %v2962_v2  ;;  %v469_v33 = vld [vmem:[#allocation11 + $0x150] sm:$0xff]  ;;  %v3955_v34 = vpack.c.bf16 %v473_v27, %v470_v25  ;;  %v472_v36 = vld [vmem:[#allocation11 + $0x168] sm:$0xff]  ;;  %v2972_v40 = vpack.c.bf16 %v158_v32, %v155_v31  ;;  %v121_v43 = vld [vmem:[#allocation10 + $0x40] sm:$0xff] }
  0x71   :  { %3025 = vmatpush1.bf16.msra.mxu0 %v3940_v1  ;;  %v115_v37 = vld [vmem:[#allocation10 + $0x10] sm:$0xff]  ;;  %v118_v38 = vld [vmem:[#allocation10 + $0x28] sm:$0xff]  ;;  %v3958_v41 = vpack.c.bf16 %v472_v36, %v469_v33  ;;  %v124_v45 = vld [vmem:[#allocation10 + $0x58] sm:$0xff] }
  0x72   :  { %3027 = vmatprep.subr.bf16.mxu0 %v3943_v6  ;;  %v2974_v42 = vpack.c.bf16 %v118_v38, %v115_v37  ;;  %v3961_v46 = vld [vmem:[#allocation5] sm:$0xff]  ;;  %v2978_v48 = vpack.c.bf16 %v124_v45, %v121_v43  ;;  %v127_v49 = vld [vmem:[#allocation10 + $0x70] sm:$0xff]  ;;  %v130_v50 = vld [vmem:[#allocation10 + $0x88] sm:$0xff] }
  0x73   :  { %2965 = vmatpush1.bf16.msra.mxu1 %v2964_v14  ;;  %v3964_v47 = vld [vmem:[#allocation8] sm:$0xff]  ;;  %v3969_v51 = vld [vmem:[#allocation5 + $0x8] sm:$0xff]  ;;  %v2982_v53 = vpack.c.bf16 %v130_v50, %v127_v49  ;;  %v3977_v56 = vld [vmem:[#allocation5 + $0x10] sm:$0xff] }
  0x74   :  { %2967 = vmatprep.subr.bf16.mxu1 %v2966_v16  ;;  %v133_v54 = vld [vmem:[#allocation10 + $0xa0] sm:$0xff]  ;;  %v136_v55 = vld [vmem:[#allocation10 + $0xb8] sm:$0xff]  ;;  %v139_v59 = vld [vmem:[#allocation10 + $0xd0] sm:$0xff] }
  0x75   :  { %3029 = vmatpush1.bf16.msra.mxu0 %v3946_v15  ;;  %v2986_v58 = vpack.c.bf16 %v136_v55, %v133_v54  ;;  %v142_v60 = vld [vmem:[#allocation10 + $0xe8] sm:$0xff]  ;;  %v108_v61 = vld [vmem:[#allocation5 + $0x18] sm:$0xff]  ;;  %v145_v63 = vld [vmem:[#allocation10 + $0x100] sm:$0xff] }
  0x76   :  { %3031 = vmatprep.subr.bf16.mxu0 %v3949_v20  ;;  %v2990_v62 = vpack.c.bf16 %v142_v60, %v139_v59  ;;  %v148_v2 = vld [vmem:[#allocation10 + $0x118] sm:$0xff]  ;;  %v151_v5 = vld [vmem:[#allocation10 + $0x130] sm:$0xff]  ;;  %v154_v7 = vld [vmem:[#allocation10 + $0x148] sm:$0xff] }
  0x77   :  { %2969 = vmatpush1.bf16.msra.mxu1 %v2968_v28  ;;  %v109_v3 = vld [vmem:[#allocation5 + $0x20] sm:$0xff]  ;;  %v2994_v4 = vpack.c.bf16 %v148_v2, %v145_v63  ;;  %v110_v8 = vld [vmem:[#allocation5 + $0x28] sm:$0xff]  ;;  %v2998_v10 = vpack.c.bf16 %v154_v7, %v151_v5  ;;  %v111_v14 = vld [vmem:[#allocation5 + $0x30] sm:$0xff] }
  0x78   :  { %2971 = vmatprep.subr.bf16.mxu1 %v2970_v30  ;;  %v157_v11 = vld [vmem:[#allocation10 + $0x160] sm:$0xff]  ;;  %v160_v12 = vld [vmem:[#allocation10 + $0x178] sm:$0xff]  ;;  %v112_v17 = vld [vmem:[#allocation5 + $0x38] sm:$0xff] }
  0x79   :  { %3033 = vmatpush1.bf16.msra.mxu0 %v3952_v29  ;;  %v3002_v16 = vpack.c.bf16 %v160_v12, %v157_v11  ;;  %v429_v18 = vld [vmem:[#allocation11 + $0x10] sm:$0xff]  ;;  %v432_v19 = vld [vmem:[#allocation11 + $0x28] sm:$0xff]  ;;  %v435_v24 = vld [vmem:[#allocation11 + $0x40] sm:$0xff] }
  0x7a   :  { %3035 = vmatprep.subr.bf16.mxu0 %v3955_v34  ;;  %v3998_v21 = vpack.c.bf16 %v432_v19, %v429_v18  ;;  %v438_v25 = vld [vmem:[#allocation11 + $0x58] sm:$0xff]  ;;  %v441_v28 = vld [vmem:[#allocation11 + $0x70] sm:$0xff]  ;;  %v444_v30 = vld [vmem:[#allocation11 + $0x88] sm:$0xff] }
  0x7b   :  { %2973 = vmatpush1.bf16.msra.mxu1 %v2972_v40  ;;  %v4005_v27 = vpack.c.bf16 %v438_v25, %v435_v24  ;;  %v4010_v31 = vpack.c.bf16 %v444_v30, %v441_v28  ;;  %v447_v32 = vld [vmem:[#allocation11 + $0xa0] sm:$0xff]  ;;  %v453_v36 = vld [vmem:[#allocation11 + $0xd0] sm:$0xff]  ;;  %v456_v37 = vld [vmem:[#allocation11 + $0xe8] sm:$0xff] }
  0x7c   :  { %2975 = vmatprep.subr.bf16.mxu1 %v2974_v42  ;;  %v4018_v38 = vpack.c.bf16 %v456_v37, %v453_v36  ;;  %v459_v40 = vld [vmem:[#allocation11 + $0x100] sm:$0xff]  ;;  %v465_v45 = vld [vmem:[#allocation11 + $0x130] sm:$0xff]  ;;  %v474_v50 = vld [vmem:[#allocation11 + $0x178] sm:$0xff] }
  0x7d   :  { %3037 = vmatpush1.bf16.msra.mxu0 %v3958_v41  ;;  %v471_v49 = vld [vmem:[#allocation11 + $0x160] sm:$0xff] }
  0x7e   :  { %3063 = vmatprep.subr.bf16.mxu0 %v3914_v9  ;;  %243 = vmatmul.mubr.f32.vlgmr.msra.gmra.mrb[0].mxu1 %v3961_v46 }
  0x7f   :  { %2977 = vmatpush3.bf16.msra.mxu1 %v2974_v42  ;;  %248 = vmatprep.mubr.f32.mxu1 %v3785_v0  ;;  %v462_v42 = vld [vmem:[#allocation11 + $0x118] sm:$0xff] }
  0x80   :  { %540 = vmatmul.mubr.f32.vlgmr.msra.gmra.mrb[0].mxu0 %v3964_v47  ;;  %2979 = vmatprep.subr.bf16.mxu1 %v2978_v48  ;;  %v4024_v43 = vpack.c.bf16 %v462_v42, %v459_v40 }
  0x81   :  { %3065 = vmatpush1.bf16.msra.mxu0 %v3916_v13  ;;  %759 = vmatprep.mubr.f32.mxu0 %v3785_v0 }
  0x82   :  { %249 = vmatmul.mubr.f32.gmra.mrb[2].mxu1 %v3969_v51  ;;  %3067 = vmatprep.subr.bf16.mxu0 %v3920_v22 }
  0x83   :  { %2981 = vmatpush3.bf16.msra.mxu1 %v2978_v48  ;;  %254 = vmatprep.mubr.f32.mxu1 %v3785_v0 }
  0x84   :  { %2983 = vmatprep.subr.bf16.mxu1 %v2982_v53 }
  0x85   :  { %3069 = vmatpush1.bf16.msra.mxu0 %v3922_v26 }
  0x86   :  { %255 = vmatmul.mubr.f32.gmra.mrb[4].mxu1 %v3977_v56  ;;  %3071 = vmatprep.subr.bf16.mxu0 %v3925_v35 }
  0x87   :  { %2985 = vmatpush3.bf16.msra.mxu1 %v2982_v53  ;;  %260 = vmatprep.mubr.f32.mxu1 %v3785_v0  ;;  %v163_v53 = vlaneseq }
  0x88   :  { %2987 = vmatprep.subr.bf16.mxu1 %v2986_v58 }
  0x89   :  { %3073 = vmatpush1.bf16.msra.mxu0 %v3928_v39  ;;  %v164_v54 = vshrl.u32 %v163_v53, 7 }
  0x8a   :  { %261 = vmatmul.mubr.f32.gmra.mrb[6].mxu1 %v108_v61  ;;  %3075 = vmatprep.subr.bf16.mxu0 %v3931_v44 }
  0x8b   :  { %2989 = vmatpush3.bf16.msra.mxu1 %v2986_v58  ;;  %266 = vmatprep.mubr.f32.mxu1 %v3785_v0  ;;  %v165_v55 = vsub.s32 0, %v164_v54  ;;  %v169_v58 = vsub.s32 1, %v164_v54  ;;  %v173_v53 = vsub.s32 2, %v164_v54 }
  0x8c   :  { %2991 = vmatprep.subr.bf16.mxu1 %v2990_v62 }
  0x8d   :  { %3077 = vmatpush1.bf16.msra.mxu0 %v3934_v52 }
  0x8e   :  { %267 = vmatmul.mubr.f32.gmra.mrb[8].mxu1 %v109_v3  ;;  %3079 = vmatprep.subr.bf16.mxu0 %v3937_v57 }
  0x8f   :  { %2993 = vmatpush3.bf16.msra.mxu1 %v2990_v62  ;;  %272 = vmatprep.mubr.f32.mxu1 %v3785_v0 }
  0x90   :  { %2995 = vmatprep.subr.bf16.mxu1 %v2994_v4 }
  0x91   :  { %3081 = vmatpush1.bf16.msra.mxu0 %v3940_v1 }
  0x92   :  { %273 = vmatmul.mubr.f32.gmra.mrb[10].mxu1 %v110_v8  ;;  %3083 = vmatprep.subr.bf16.mxu0 %v3943_v6 }
  0x93   :  { %2997 = vmatpush3.bf16.msra.mxu1 %v2994_v4  ;;  %278 = vmatprep.mubr.f32.mxu1 %v3785_v0 }
  0x94   :  { %2999 = vmatprep.subr.bf16.mxu1 %v2998_v10 }
  0x95   :  { %3085 = vmatpush1.bf16.msra.mxu0 %v3946_v15 }
  0x96   :  { %279 = vmatmul.mubr.f32.gmra.mrb[12].mxu1 %v111_v14  ;;  %3087 = vmatprep.subr.bf16.mxu0 %v3949_v20 }
  0x97   :  { %3001 = vmatpush3.bf16.msra.mxu1 %v2998_v10  ;;  %284 = vmatprep.mubr.f32.mxu1 %v3785_v0 }
  0x98   :  { %3003 = vmatprep.subr.bf16.mxu1 %v3002_v16 }
  0x99   :  { %3089 = vmatpush1.bf16.msra.mxu0 %v3952_v29 }
  0x9a   :  { %285 = vmatmul.mubr.f32.gmra.mrb[14].mxu1 %v112_v17  ;;  %3091 = vmatprep.subr.bf16.mxu0 %v3955_v34 }
  0x9b   :  { %3005 = vmatpush3.bf16.msra.mxu1 %v3002_v16  ;;  %2606 = vmatprep.mubr.f32.mxu1 %v3961_v46  ;;  %v468_v46 = vld [vmem:[#allocation11 + $0x148] sm:$0xff] }
  0x9c   :  { %3038 = vmatprep.subr.bf16.mxu1 %v3786_v23  ;;  %v4028_v48 = vpack.c.bf16 %v468_v46, %v465_v45 }
  0x9d   :  { %3093 = vmatpush1.bf16.msra.mxu0 %v3958_v41 }
  0x9e   :  { %2607 = vmatmul.mubr.f32.vlgmr.msra.gmra.mrb[16].mxu1 %v3969_v51  ;;  %3119 = vmatprep.subr.bf16.mxu0 %v3914_v9  ;;  %v450_v9 = vld [vmem:[#allocation11 + $0xb8] sm:$0xff]  ;;  %v4032_v51 = vpack.c.bf16 %v474_v50, %v471_v49 }
  0x9f   :  { %3040 = vmatpush3.bf16.msra.mxu1 %v3998_v21  ;;  %2609 = vmatprep.mubr.f32.mxu1 %v3977_v56  ;;  %v4014_v33 = vpack.c.bf16 %v450_v9, %v447_v32  ;;  %v161_v56 = vld [vmem:[%s4456_s3] sm:$0x7] }
  0xa0   :  { %3041 = vmatprep.subr.bf16.mxu1 %v3786_v23  ;;  %v166_v59 = vrot.slane %v161_v56, %v165_v55  ;;  %v170_v60 = vrot.slane %v161_v56, %v169_v58 }
  0xa2   :  { %2610 = vmatmul.mubr.f32.gmra.mrb[18].mxu1 %v108_v61 }
  0xa3   :  { %3043 = vmatpush3.bf16.msra.mxu1 %v4005_v27  ;;  %2612 = vmatprep.mubr.f32.mxu1 %v109_v3 }
  0xa4   :  { %3044 = vmatprep.subr.bf16.mxu1 %v3786_v23 }
  0xa6   :  { %2613 = vmatmul.mubr.f32.gmra.mrb[20].mxu1 %v110_v8 }
  0xa7   :  { %3046 = vmatpush3.bf16.msra.mxu1 %v4010_v31  ;;  %2615 = vmatprep.mubr.f32.mxu1 %v111_v14 }
  0xa8   :  { %3047 = vmatprep.subr.bf16.mxu1 %v3786_v23 }
  0xaa   :  { %2616 = vmatmul.mubr.f32.gmra.mrb[22].mxu1 %v112_v17 }
  0xab   :  { %3049 = vmatpush3.bf16.msra.mxu1 %v4014_v33  ;;  %2650 = vmatprep.mubr.msk.f32.mxu1 %vm3787_vm0, %v3785_v0 }
  0xac   :  { %3050 = vmatprep.subr.bf16.mxu1 %v3786_v23 }
  0xaf   :  { %3052 = vmatpush3.bf16.msra.mxu1 %v4018_v38 }
  0xb0   :  { %3053 = vmatprep.subr.bf16.mxu1 %v3786_v23 }
  0xb3   :  { %3055 = vmatpush3.bf16.msra.mxu1 %v4024_v43 }
  0xb4   :  { %3056 = vmatprep.subr.bf16.mxu1 %v3786_v23 }
  0xb7   :  { %3058 = vmatpush3.bf16.msra.mxu1 %v4028_v48 }
  0xb8   :  { %3059 = vmatprep.subr.bf16.mxu1 %v3786_v23 }
  0xbb   :  { %3061 = vmatpush3.bf16.msra.mxu1 %v4032_v51 }
  0xbc   :  { %3094 = vmatprep.subr.bf16.mxu1 %v3786_v23 }
  0xbe   :  { %2651 = vmatmul.mubr.f32.vlgmr.msra.gmra.mrb[24].mxu1 %v3964_v47 }
  0xbf   :  { %3096 = vmatpush3.bf16.msra.mxu1 %v3998_v21  ;;  %2685 = vmatprep.mubr.msk.f32.mxu1 %vm3787_vm0, %v3785_v0 }
  0xc0   :  { %3097 = vmatprep.subr.bf16.mxu1 %v3786_v23 }
  0xc3   :  { %3099 = vmatpush3.bf16.msra.mxu1 %v4005_v27 }
  0xc4   :  { %3100 = vmatprep.subr.bf16.mxu1 %v3786_v23 }
  0xc7   :  { %3102 = vmatpush3.bf16.msra.mxu1 %v4010_v31 }
  0xc8   :  { %3103 = vmatprep.subr.bf16.mxu1 %v3786_v23 }
  0xcb   :  { %3105 = vmatpush3.bf16.msra.mxu1 %v4014_v33 }
  0xcc   :  { %3106 = vmatprep.subr.bf16.mxu1 %v3786_v23 }
  0xcf   :  { %3108 = vmatpush3.bf16.msra.mxu1 %v4018_v38 }
  0xd0   :  { %3109 = vmatprep.subr.bf16.mxu1 %v3786_v23 }
  0xd3   :  { %3111 = vmatpush3.bf16.msra.mxu1 %v4024_v43 }
  0xd4   :  { %3112 = vmatprep.subr.bf16.mxu1 %v3786_v23 }
  0xd7   :  { %3114 = vmatpush3.bf16.msra.mxu1 %v4028_v48 }
  0xd8   :  { %3115 = vmatprep.subr.bf16.mxu1 %v3786_v23 }
  0xdb   :  { %3117 = vmatpush3.bf16.msra.mxu1 %v4032_v51 }
  0xdc   :  { %3150 = vmatprep.subr.bf16.mxu1 %v3786_v23 }
 0x151   :  { %v244_v61 = vpop.f32.mrb[0].mxu1 }
 0x152   :  { %v245_v62 = vadd.f32 %v244_v61, %v166_v59  ;;  %v246_v63 = vpop.f32.mrb[1].mxu1 }
 0x153   :  { %v541_v2 = vpop.f32.mrb[0].mxu0  ;;  %v247_v3 = vadd.f32 %v246_v63, %v170_v60  ;;  %v174_v63 = vrot.slane %v161_v56, %v173_v53  ;;  %v4104_v53 = vld [vmem:[%s4458_s5] sm:$0xff] }
 0x154   :  { %v543_v4 = vpop.f32.mrb[1].mxu0  ;;  %v616_v5 = vadd.f32 %v541_v2, %v245_v62 }
 0x155   :  { %v623_v7 = vadd.f32 %v543_v4, %v247_v3  ;;  %v250_v8 = vpop.f32.mrb[2].mxu1 }
 0x156   :  { %v4059_v10 = vadd.f32 %v250_v8, %v166_v59  ;;  %v252_v11 = vpop.f32.mrb[3].mxu1 }
 0x157   :  { %v4061_v12 = vadd.f32 %v252_v11, %v170_v60  ;;  %v2373_v11 = vmul.f32 -1.442695, %v616_v5 }
 0x159   :  { %v256_v14 = vpop.f32.mrb[4].mxu1  ;;  %3532 = vpow2.f32 %v2373_v11 }
 0x15a   :  { %v4063_v16 = vadd.f32 %v256_v14, %v166_v59  ;;  %v258_v17 = vpop.f32.mrb[5].mxu1 }
 0x15b   :  { %v4065_v18 = vadd.f32 %v258_v17, %v170_v60 }
 0x15d   :  { %v262_v19 = vpop.f32.mrb[6].mxu1 }
 0x15e   :  { %v4067_v24 = vadd.f32 %v262_v19, %v166_v59  ;;  %v264_v25 = vpop.f32.mrb[7].mxu1 }
 0x15f   :  { %v4069_v28 = vadd.f32 %v264_v25, %v170_v60 }
 0x161   :  { %v268_v30 = vpop.f32.mrb[8].mxu1 }
 0x162   :  { %v4071_v32 = vadd.f32 %v268_v30, %v166_v59  ;;  %v270_v9 = vpop.f32.mrb[9].mxu1 }
 0x163   :  { %v4073_v36 = vadd.f32 %v270_v9, %v170_v60  ;;  %v3533_v5 = vpop.eup %3532 }
 0x165   :  { %v274_v37 = vpop.f32.mrb[10].mxu1 }
 0x166   :  { %v4075_v40 = vadd.f32 %v274_v37, %v166_v59  ;;  %v276_v42 = vpop.f32.mrb[11].mxu1 }
 0x167   :  { %v4077_v45 = vadd.f32 %v276_v42, %v170_v60 }
 0x169   :  { %v280_v46 = vpop.f32.mrb[12].mxu1 }
 0x16a   :  { %v4079_v49 = vadd.f32 %v280_v46, %v166_v59  ;;  %v282_v50 = vpop.f32.mrb[13].mxu1  ;;  %v2374_v46 = vmul.f32 -1.442695, %v623_v7 }
 0x16b   :  { %v4081_v55 = vadd.f32 %v282_v50, %v170_v60  ;;  %v620_v50 = vadd.f32 1.0, %v3533_v5 }
 0x16c   :  { %3534 = vpow2.f32 %v2374_v46 }
 0x16d   :  { %v286_v58 = vpop.f32.mrb[14].mxu1  ;;  %3536 = vrcp.f32 %v620_v50 }
 0x16e   :  { %v4083_v61 = vadd.f32 %v286_v58, %v166_v59  ;;  %v288_v62 = vpop.f32.mrb[15].mxu1 }
 0x16f   :  { %v4085_v2 = vadd.f32 %v288_v62, %v170_v60 }
 0x171   :  { %v2608_v3 = vpop.f32.mrb[16].mxu1 }
 0x172   :  { %v4087_v4 = vadd.f32 %v2608_v3, %v174_v63  ;;  %v357_v8 = vpop.f32.mrb[17].mxu1 }
 0x175   :  { %v2611_v14 = vpop.f32.mrb[18].mxu1 }
 0x176   :  { %v4089_v17 = vadd.f32 %v2611_v14, %v174_v63  ;;  %v367_v19 = vpop.f32.mrb[19].mxu1  ;;  %v3535_v62 = vpop.eup %3534 }
 0x177   :  { %v4091_v25 = vadd.f32 %v367_v19, %v174_v63  ;;  %v3537_v14 = vpop.eup %3536  ;;  %v358_v19 = vadd.f32 %v357_v8, %v174_v63 }
 0x179   :  { %v2614_v54 = vpop.f32.mrb[20].mxu1 }
 0x17a   :  { %v4093_v30 = vadd.f32 %v2614_v54, %v174_v63  ;;  %v377_v59 = vpop.f32.mrb[21].mxu1 }
 0x17b   :  { %v4095_v9 = vadd.f32 %v377_v59, %v174_v63  ;;  %v627_v59 = vadd.f32 1.0, %v3535_v62 }
 0x17d   :  { %v2617_v56 = vpop.f32.mrb[22].mxu1 }
 0x17e   :  { %v4097_v60 = vadd.f32 %v2617_v56, %v174_v63  ;;  %v387_v37 = vpop.f32.mrb[23].mxu1 }
 0x17f   :  { %v4099_v42 = vadd.f32 %v387_v37, %v174_v63 }
 0x191   :  { %v612_v58 = vpop.f32.mrb[24].mxu1 }
 0x192   :  { %v631_v3 = vadd.f32 %v4104_v53, %v612_v58  ;;  %v2652_v11 = vpop.f32.mrb[25].mxu1 }
 0x194   :  { %v632_v54 = vmul.f32 %v3537_v14, %v631_v3  ;;  %v1095_v3 = vld [vmem:[#allocation11 + $0x30] sm:$0xff]  ;;  %v1102_v14 = vld [vmem:[#allocation11 + $0x68] sm:$0xff] }
 0x196   :  { %v633_v56 = vadd.f32 %v632_v54, %v358_v19  ;;  %v1105_v19 = vld [vmem:[#allocation11 + $0x80] sm:$0xff] }
 0x197   :  { %v4186_v54 = vpack.c.bf16 %v1105_v19, %v1102_v14 }
 0x198   :  { %3538 = vtanh.f32 %v633_v56  ;;  %v1104_v56 = vld [vmem:[#allocation11 + $0x78] sm:$0xff] }
 0x199   :  { %3540 = vrcp.f32 %v627_v59  ;;  %v1101_v59 = vld [vmem:[#allocation11 + $0x60] sm:$0xff] }
 0x1a2   :  { %v3539_v7 = vpop.eup %3538 }
 0x1a3   :  { %v635_v37 = vsub.f32 %v3964_v47, %v3539_v7  ;;  %v3541_v5 = vpop.eup %3540 }
 0x1a5   :  { %v636_v46 = vmul.f32 %v3541_v5, %v635_v37  ;;  %v1108_v37 = vld [vmem:[#allocation11 + $0x98] sm:$0xff]  ;;  %v1111_v5 = vld [vmem:[#allocation11 + $0xb0] sm:$0xff] }
 0x1a7   :  { %v4108_v50 = vadd.f32 %v3539_v7, %v636_v46  ;;  %v4188_v7 = vpack.c.bf16 %v1104_v56, %v1101_v59  ;;  %v4192_v46 = vpack.c.bf16 %v1111_v5, %v1108_v37 }
 0x1a9   :  { %760 = vmatmul.mubr.f32.vlgmr.msra.gmra.mrb[2].mxu0 %v4108_v50  ;;  %2686 = vmatmul.mubr.f32.vlgmr.msra.gmra.mrb[26].mxu1 %v4108_v50 }
 0x1aa   :  { %3121 = vmatpush1.bf16.msra.mxu0 %v3916_v13  ;;  %3152 = vmatpush3.bf16.msra.mxu1 %v3998_v21 }
 0x1ab   :  { %3123 = vmatprep.subr.bf16.mxu0 %v3920_v22  ;;  %3153 = vmatprep.subr.bf16.mxu1 %v3786_v23 }
 0x1ac   :  { %980 = vmatprep.mubr.f32.mxu0 %v3785_v0  ;;  %2720 = vmatprep.mubr.msk.f32.mxu1 %vm3787_vm0, %v3785_v0 }
 0x1ae   :  { %3125 = vmatpush1.bf16.msra.mxu0 %v3922_v26  ;;  %3155 = vmatpush3.bf16.msra.mxu1 %v4005_v27 }
 0x1af   :  { %3127 = vmatprep.subr.bf16.mxu0 %v3925_v35  ;;  %3156 = vmatprep.subr.bf16.mxu1 %v3786_v23 }
 0x1b2   :  { %3129 = vmatpush1.bf16.msra.mxu0 %v3928_v39  ;;  %3158 = vmatpush3.bf16.msra.mxu1 %v4010_v31 }
 0x1b3   :  { %3131 = vmatprep.subr.bf16.mxu0 %v3931_v44  ;;  %3159 = vmatprep.subr.bf16.mxu1 %v3786_v23 }
 0x1b6   :  { %3133 = vmatpush1.bf16.msra.mxu0 %v3934_v52  ;;  %3161 = vmatpush3.bf16.msra.mxu1 %v4014_v33 }
 0x1b7   :  { %3135 = vmatprep.subr.bf16.mxu0 %v3937_v57  ;;  %3162 = vmatprep.subr.bf16.mxu1 %v3786_v23 }
 0x1ba   :  { %3137 = vmatpush1.bf16.msra.mxu0 %v3940_v1  ;;  %3164 = vmatpush3.bf16.msra.mxu1 %v4018_v38 }
 0x1bb   :  { %3139 = vmatprep.subr.bf16.mxu0 %v3943_v6  ;;  %3165 = vmatprep.subr.bf16.mxu1 %v3786_v23 }
 0x1be   :  { %3141 = vmatpush1.bf16.msra.mxu0 %v3946_v15  ;;  %3167 = vmatpush3.bf16.msra.mxu1 %v4024_v43 }
 0x1bf   :  { %3143 = vmatprep.subr.bf16.mxu0 %v3949_v20  ;;  %3168 = vmatprep.subr.bf16.mxu1 %v3786_v23 }
 0x1c2   :  { %3145 = vmatpush1.bf16.msra.mxu0 %v3952_v29  ;;  %3170 = vmatpush3.bf16.msra.mxu1 %v4028_v48 }
 0x1c3   :  { %3147 = vmatprep.subr.bf16.mxu0 %v3955_v34  ;;  %3171 = vmatprep.subr.bf16.mxu1 %v3786_v23 }
 0x1c6   :  { %3149 = vmatpush1.bf16.msra.mxu0 %v3958_v41  ;;  %3173 = vmatpush3.bf16.msra.mxu1 %v4032_v51 }
 0x1c7   :  { %3206 = vmatprep.subr.bf16.mxu1 %v3786_v23 }
 0x27c   :  { %v761_v13 = vpop.f32.mrb[2].mxu0  ;;  %v832_v22 = vpop.f32.mrb[26].mxu1 }
 0x27d   :  { %v836_v26 = vadd.f32 %v761_v13, %v4059_v10  ;;  %v763_v35 = vpop.f32.mrb[3].mxu0  ;;  %v2687_v39 = vpop.f32.mrb[27].mxu1  ;;  %v851_v20 = vadd.f32 %v832_v22, %v4104_v53  ;;  %v1107_v13 = vld [vmem:[#allocation11 + $0x90] sm:$0xff]  ;;  %v1110_v22 = vld [vmem:[#allocation11 + $0xa8] sm:$0xff] }
 0x27e   :  { %v843_v44 = vadd.f32 %v763_v35, %v4061_v12  ;;  %v1114_v35 = vld [vmem:[#allocation11 + $0xc8] sm:$0xff]  ;;  %v1117_v39 = vld [vmem:[#allocation11 + $0xe0] sm:$0xff] }
 0x27f   :  { %v2375_v52 = vmul.f32 -1.442695, %v836_v26  ;;  %v4194_v26 = vpack.c.bf16 %v1110_v22, %v1107_v13 }
 0x280   :  { %v2376_v57 = vmul.f32 -1.442695, %v843_v44  ;;  %v4198_v44 = vpack.c.bf16 %v1117_v39, %v1114_v35 }
 0x281   :  { %3542 = vpow2.f32 %v2375_v52  ;;  %v1113_v52 = vld [vmem:[#allocation11 + $0xc0] sm:$0xff] }
 0x282   :  { %3544 = vpow2.f32 %v2376_v57  ;;  %v1116_v57 = vld [vmem:[#allocation11 + $0xd8] sm:$0xff] }
 0x28b   :  { %v3543_v1 = vpop.eup %3542 }
 0x28c   :  { %v840_v6 = vadd.f32 1.0, %v3543_v1  ;;  %v3545_v15 = vpop.eup %3544  ;;  %v4200_v1 = vpack.c.bf16 %v1116_v57, %v1113_v52 }
 0x28d   :  { %v847_v47 = vadd.f32 1.0, %v3545_v15  ;;  %v1123_v15 = vld [vmem:[#allocation11 + $0x110] sm:$0xff] }
 0x28e   :  { %3546 = vrcp.f32 %v840_v6  ;;  %v1120_v6 = vld [vmem:[#allocation11 + $0xf8] sm:$0xff] }
 0x298   :  { %v3547_v29 = vpop.eup %3546 }
 0x299   :  { %v852_v34 = vmul.f32 %v3547_v29, %v851_v20  ;;  %v1119_v20 = vld [vmem:[#allocation11 + $0xf0] sm:$0xff]  ;;  %v4203_v29 = vpack.c.bf16 %v1123_v15, %v1120_v6 }
 0x29b   :  { %v853_v41 = vadd.f32 %v852_v34, %v4087_v4  ;;  %v1122_v34 = vld [vmem:[#allocation11 + $0x108] sm:$0xff] }
 0x29d   :  { %3548 = vtanh.f32 %v853_v41  ;;  %v1126_v41 = vld [vmem:[#allocation11 + $0x128] sm:$0xff] }
 0x29e   :  { %3550 = vrcp.f32 %v847_v47  ;;  %v1129_v47 = vld [vmem:[#allocation11 + $0x140] sm:$0xff] }
 0x2a7   :  { %v3549_v10 = vpop.eup %3548 }
 0x2a8   :  { %v855_v12 = vsub.f32 %v4108_v50, %v3549_v10  ;;  %v3551_v63 = vpop.eup %3550 }
 0x2aa   :  { %v856_v8 = vmul.f32 %v3551_v63, %v855_v12  ;;  %v4209_v12 = vpack.c.bf16 %v1129_v47, %v1126_v41  ;;  %v1125_v63 = vld [vmem:[#allocation11 + $0x120] sm:$0xff] }
 0x2ac   :  { %v4151_v58 = vadd.f32 %v3549_v10, %v856_v8  ;;  %v4206_v10 = vpack.c.bf16 %v1122_v34, %v1119_v20  ;;  %v1128_v8 = vld [vmem:[#allocation11 + $0x138] sm:$0xff] }
 0x2ae   :  { %981 = vmatmul.mubr.f32.vlgmr.msra.gmra.mrb[4].mxu0 %v4151_v58  ;;  %2721 = vmatmul.mubr.f32.vlgmr.msra.gmra.mrb[28].mxu1 %v4151_v58 }
 0x2af   :  { %3208 = vmatpush3.bf16.msra.mxu1 %v3998_v21  ;;  %1201 = vmatprep.mubr.f32.mxu0 %v3785_v0  ;;  %v1090_v21 = vld [vmem:[#allocation11 + $0x8] sm:$0xff] }
 0x2b0   :  { %3209 = vmatprep.subr.bf16.mxu1 %v3786_v23  ;;  %2755 = vmatprep.mubr.msk.f32.mxu1 %vm3787_vm0, %v3785_v0 }
 0x2b3   :  { %3211 = vmatpush3.bf16.msra.mxu1 %v4005_v27  ;;  %v1093_v27 = vld [vmem:[#allocation11 + $0x20] sm:$0xff] }
 0x2b4   :  { %3212 = vmatprep.subr.bf16.mxu1 %v3786_v23 }
 0x2b7   :  { %3214 = vmatpush3.bf16.msra.mxu1 %v4010_v31  ;;  %v4174_v31 = vpack.c.bf16 %v1093_v27, %v1090_v21  ;;  %v1132_v21 = vld [vmem:[#allocation11 + $0x158] sm:$0xff]  ;;  %v1135_v27 = vld [vmem:[#allocation11 + $0x170] sm:$0xff] }
 0x2b8   :  { %3215 = vmatprep.subr.bf16.mxu1 %v3786_v23 }
 0x2b9   :  { %3175 = vmatprep.subr.bf16.mxu0 %v4174_v31 }
 0x2bb   :  { %3217 = vmatpush3.bf16.msra.mxu1 %v4014_v33  ;;  %v1089_v33 = vld [vmem:[#allocation11] sm:$0xff] }
 0x2bc   :  { %3218 = vmatprep.subr.bf16.mxu1 %v3786_v23 }
 0x2bf   :  { %3220 = vmatpush3.bf16.msra.mxu1 %v4018_v38  ;;  %v1092_v38 = vld [vmem:[#allocation11 + $0x18] sm:$0xff] }
 0x2c0   :  { %3221 = vmatprep.subr.bf16.mxu1 %v3786_v23  ;;  %v4176_v4 = vpack.c.bf16 %v1092_v38, %v1089_v33  ;;  %v4212_v33 = vpack.c.bf16 %v1128_v8, %v1125_v63  ;;  %v4215_v38 = vpack.c.bf16 %v1135_v27, %v1132_v21  ;;  %v1315_v63 = vld [vmem:[#allocation11 + $0x28] sm:$0xff]  ;;  %v1318_v21 = vld [vmem:[#allocation11 + $0x40] sm:$0xff]  ;;  %v1321_v27 = vld [vmem:[#allocation11 + $0x58] sm:$0xff] }
 0x2c2   :  { %3177 = vmatpush1.bf16.msra.mxu0 %v4176_v4 }
 0x2c3   :  { %3223 = vmatpush3.bf16.msra.mxu1 %v4024_v43  ;;  %v1096_v43 = vld [vmem:[#allocation11 + $0x38] sm:$0xff] }
 0x2c4   :  { %3224 = vmatprep.subr.bf16.mxu1 %v3786_v23 }
 0x2c7   :  { %3226 = vmatpush3.bf16.msra.mxu1 %v4028_v48  ;;  %v1099_v48 = vld [vmem:[#allocation11 + $0x50] sm:$0xff] }
 0x2c8   :  { %3227 = vmatprep.subr.bf16.mxu1 %v3786_v23  ;;  %v4180_v62 = vpack.c.bf16 %v1099_v48, %v1096_v43  ;;  %v1131_v43 = vld [vmem:[#allocation11 + $0x150] sm:$0xff]  ;;  %v1134_v48 = vld [vmem:[#allocation11 + $0x168] sm:$0xff] }
 0x2ca   :  { %3179 = vmatprep.subr.bf16.mxu0 %v4180_v62 }
 0x2cb   :  { %3229 = vmatpush3.bf16.msra.mxu1 %v4032_v51  ;;  %v1098_v51 = vld [vmem:[#allocation11 + $0x48] sm:$0xff] }
 0x2cc   :  { %3262 = vmatprep.subr.bf16.mxu1 %v3786_v23  ;;  %v4182_v11 = vpack.c.bf16 %v1098_v51, %v1095_v3  ;;  %v4218_v3 = vpack.c.bf16 %v1134_v48, %v1131_v43  ;;  %v4255_v43 = vpack.c.bf16 %v1321_v27, %v1318_v21  ;;  %v1324_v48 = vld [vmem:[#allocation11 + $0x70] sm:$0xff] }
 0x2ce   :  { %3181 = vmatpush1.bf16.msra.mxu0 %v4182_v11 }
 0x2cf   :  { %3183 = vmatprep.subr.bf16.mxu0 %v4186_v54 }
 0x2d2   :  { %3185 = vmatpush1.bf16.msra.mxu0 %v4188_v7 }
 0x2d3   :  { %3187 = vmatprep.subr.bf16.mxu0 %v4192_v46 }
 0x2d6   :  { %3189 = vmatpush1.bf16.msra.mxu0 %v4194_v26 }
 0x2d7   :  { %3191 = vmatprep.subr.bf16.mxu0 %v4198_v44 }
 0x2da   :  { %3193 = vmatpush1.bf16.msra.mxu0 %v4200_v1 }
 0x2db   :  { %3195 = vmatprep.subr.bf16.mxu0 %v4203_v29 }
 0x2de   :  { %3197 = vmatpush1.bf16.msra.mxu0 %v4206_v10 }
 0x2df   :  { %3199 = vmatprep.subr.bf16.mxu0 %v4209_v12 }
 0x2e2   :  { %3201 = vmatpush1.bf16.msra.mxu0 %v4212_v33 }
 0x2e3   :  { %3203 = vmatprep.subr.bf16.mxu0 %v4215_v38 }
 0x2e6   :  { %3205 = vmatpush1.bf16.msra.mxu0 %v4218_v3 }
 0x2e7   :  { %3231 = vmatprep.subr.bf16.mxu0 %v4174_v31 }
 0x381   :  { %v982_v51 = vpop.f32.mrb[4].mxu0  ;;  %v1053_v14 = vpop.f32.mrb[28].mxu1 }
 0x382   :  { %v1057_v19 = vadd.f32 %v982_v51, %v4063_v16  ;;  %v984_v59 = vpop.f32.mrb[5].mxu0  ;;  %v2722_v56 = vpop.f32.mrb[29].mxu1  ;;  %v1072_v52 = vadd.f32 %v1053_v14, %v4104_v53  ;;  %v1327_v51 = vld [vmem:[#allocation11 + $0x88] sm:$0xff] }
 0x383   :  { %v1064_v37 = vadd.f32 %v984_v59, %v4065_v18  ;;  %v4259_v14 = vpack.c.bf16 %v1327_v51, %v1324_v48  ;;  %v1333_v59 = vld [vmem:[#allocation11 + $0xb8] sm:$0xff] }
 0x384   :  { %v2377_v5 = vmul.f32 -1.442695, %v1057_v19  ;;  %v1330_v19 = vld [vmem:[#allocation11 + $0xa0] sm:$0xff] }
 0x385   :  { %v2378_v13 = vmul.f32 -1.442695, %v1064_v37  ;;  %v4263_v56 = vpack.c.bf16 %v1333_v59, %v1330_v19  ;;  %v1336_v37 = vld [vmem:[#allocation11 + $0xd0] sm:$0xff] }
 0x386   :  { %3552 = vpow2.f32 %v2377_v5  ;;  %v1339_v5 = vld [vmem:[#allocation11 + $0xe8] sm:$0xff] }
 0x387   :  { %3554 = vpow2.f32 %v2378_v13  ;;  %v4267_v13 = vpack.c.bf16 %v1339_v5, %v1336_v37 }
 0x390   :  { %v3553_v22 = vpop.eup %3552 }
 0x391   :  { %v1061_v35 = vadd.f32 1.0, %v3553_v22  ;;  %v3555_v39 = vpop.eup %3554  ;;  %v1342_v22 = vld [vmem:[#allocation11 + $0x100] sm:$0xff] }
 0x392   :  { %v1068_v20 = vadd.f32 1.0, %v3555_v39 }
 0x393   :  { %3556 = vrcp.f32 %v1061_v35  ;;  %v1345_v35 = vld [vmem:[#allocation11 + $0x118] sm:$0xff] }
 0x394   :  { %v4270_v39 = vpack.c.bf16 %v1345_v35, %v1342_v22 }
 0x39d   :  { %v3557_v57 = vpop.eup %3556 }
 0x39e   :  { %v1073_v6 = vmul.f32 %v3557_v57, %v1072_v52  ;;  %v1348_v52 = vld [vmem:[#allocation11 + $0x130] sm:$0xff]  ;;  %v1351_v57 = vld [vmem:[#allocation11 + $0x148] sm:$0xff] }
 0x3a0   :  { %v1074_v15 = vadd.f32 %v1073_v6, %v4091_v25  ;;  %v1312_v25 = vld [vmem:[#allocation11 + $0x10] sm:$0xff]  ;;  %v4274_v6 = vpack.c.bf16 %v1351_v57, %v1348_v52 }
 0x3a1   :  { %v4251_v8 = vpack.c.bf16 %v1315_v63, %v1312_v25 }
 0x3a2   :  { %3558 = vtanh.f32 %v1074_v15  ;;  %v1354_v15 = vld [vmem:[#allocation11 + $0x160] sm:$0xff] }
 0x3a3   :  { %3560 = vrcp.f32 %v1068_v20  ;;  %v1357_v20 = vld [vmem:[#allocation11 + $0x178] sm:$0xff] }
 0x3ac   :  { %v3559_v16 = vpop.eup %3558 }
 0x3ad   :  { %v1076_v18 = vsub.f32 %v4151_v58, %v3559_v16  ;;  %v3561_v34 = vpop.eup %3560 }
 0x3af   :  { %v1077_v41 = vmul.f32 %v3561_v34, %v1076_v18 }
 0x3b1   :  { %v4228_v47 = vadd.f32 %v3559_v16, %v1077_v41  ;;  %v4278_v16 = vpack.c.bf16 %v1357_v20, %v1354_v15 }
 0x3b3   :  { %1202 = vmatmul.mubr.f32.vlgmr.msra.gmra.mrb[6].mxu0 %v4228_v47  ;;  %2756 = vmatmul.mubr.f32.vlgmr.msra.gmra.mrb[30].mxu1 %v4228_v47 }
 0x3b4   :  { %3233 = vmatpush1.bf16.msra.mxu0 %v4176_v4  ;;  %1422 = vmatprep.mubr.f32.mxu0 %v3785_v0 }
 0x3b5   :  { %3235 = vmatprep.subr.bf16.mxu0 %v4180_v62  ;;  %2790 = vmatprep.mubr.msk.f32.mxu1 %vm3787_vm0, %v3785_v0 }
 0x3b6   :  { %3264 = vmatpush3.bf16.msra.mxu1 %v4251_v8 }
 0x3b7   :  { %3265 = vmatprep.subr.bf16.mxu1 %v3786_v23 }
 0x3b8   :  { %3237 = vmatpush1.bf16.msra.mxu0 %v4182_v11 }
 0x3b9   :  { %3239 = vmatprep.subr.bf16.mxu0 %v4186_v54 }
 0x3ba   :  { %3267 = vmatpush3.bf16.msra.mxu1 %v4255_v43 }
 0x3bb   :  { %3268 = vmatprep.subr.bf16.mxu1 %v3786_v23 }
 0x3bc   :  { %3241 = vmatpush1.bf16.msra.mxu0 %v4188_v7 }
 0x3bd   :  { %3243 = vmatprep.subr.bf16.mxu0 %v4192_v46 }
 0x3be   :  { %3270 = vmatpush3.bf16.msra.mxu1 %v4259_v14 }
 0x3bf   :  { %3271 = vmatprep.subr.bf16.mxu1 %v3786_v23 }
 0x3c0   :  { %3245 = vmatpush1.bf16.msra.mxu0 %v4194_v26 }
 0x3c1   :  { %3247 = vmatprep.subr.bf16.mxu0 %v4198_v44 }
 0x3c2   :  { %3273 = vmatpush3.bf16.msra.mxu1 %v4263_v56 }
 0x3c3   :  { %3274 = vmatprep.subr.bf16.mxu1 %v3786_v23 }
 0x3c4   :  { %3249 = vmatpush1.bf16.msra.mxu0 %v4200_v1 }
 0x3c5   :  { %3251 = vmatprep.subr.bf16.mxu0 %v4203_v29 }
 0x3c6   :  { %3276 = vmatpush3.bf16.msra.mxu1 %v4267_v13 }
 0x3c7   :  { %3277 = vmatprep.subr.bf16.mxu1 %v3786_v23 }
 0x3c8   :  { %3253 = vmatpush1.bf16.msra.mxu0 %v4206_v10 }
 0x3c9   :  { %3255 = vmatprep.subr.bf16.mxu0 %v4209_v12 }
 0x3ca   :  { %3279 = vmatpush3.bf16.msra.mxu1 %v4270_v39 }
 0x3cb   :  { %3280 = vmatprep.subr.bf16.mxu1 %v3786_v23 }
 0x3cc   :  { %3257 = vmatpush1.bf16.msra.mxu0 %v4212_v33 }
 0x3cd   :  { %3259 = vmatprep.subr.bf16.mxu0 %v4215_v38 }
 0x3ce   :  { %3282 = vmatpush3.bf16.msra.mxu1 %v4274_v6 }
 0x3cf   :  { %3283 = vmatprep.subr.bf16.mxu1 %v3786_v23 }
 0x3d0   :  { %3261 = vmatpush1.bf16.msra.mxu0 %v4218_v3 }
 0x3d1   :  { %3287 = vmatprep.subr.bf16.mxu0 %v4174_v31 }
 0x3d2   :  { %3285 = vmatpush3.bf16.msra.mxu1 %v4278_v16 }
 0x3d3   :  { %3318 = vmatprep.subr.bf16.mxu1 %v3786_v23 }
 0x486   :  { %v1203_v18 = vpop.f32.mrb[6].mxu0  ;;  %v1274_v34 = vpop.f32.mrb[30].mxu1 }
 0x487   :  { %v1278_v41 = vadd.f32 %v1203_v18, %v4067_v24  ;;  %v1205_v25 = vpop.f32.mrb[7].mxu0  ;;  %v2757_v63 = vpop.f32.mrb[31].mxu1  ;;  %v1293_v37 = vadd.f32 %v1274_v34, %v4104_v53 }
 0x488   :  { %v1285_v21 = vadd.f32 %v1205_v25, %v4069_v28 }
 0x489   :  { %v2379_v27 = vmul.f32 -1.442695, %v1278_v41 }
 0x48a   :  { %v2380_v48 = vmul.f32 -1.442695, %v1285_v21 }
 0x48b   :  { %3562 = vpow2.f32 %v2379_v27 }
 0x48c   :  { %3564 = vpow2.f32 %v2380_v48 }
 0x495   :  { %v3563_v51 = vpop.eup %3562 }
 0x496   :  { %v1282_v19 = vadd.f32 1.0, %v3563_v51  ;;  %v3565_v59 = vpop.eup %3564 }
 0x497   :  { %v1289_v52 = vadd.f32 1.0, %v3565_v59 }
 0x498   :  { %3566 = vrcp.f32 %v1282_v19 }
 0x4a2   :  { %v3567_v5 = vpop.eup %3566 }
 0x4a3   :  { %v1294_v22 = vmul.f32 %v3567_v5, %v1293_v37 }
 0x4a5   :  { %v1295_v35 = vadd.f32 %v1294_v22, %v4089_v17 }
 0x4a7   :  { %3568 = vtanh.f32 %v1295_v35 }
 0x4a8   :  { %3570 = vrcp.f32 %v1289_v52 }
 0x4b1   :  { %v3569_v24 = vpop.eup %3568 }
 0x4b2   :  { %v1297_v28 = vsub.f32 %v4228_v47, %v3569_v24  ;;  %v3571_v57 = vpop.eup %3570 }
 0x4b4   :  { %v1298_v15 = vmul.f32 %v3571_v57, %v1297_v28 }
 0x4b6   :  { %v4288_v20 = vadd.f32 %v3569_v24, %v1298_v15 }
 0x4b8   :  { %1423 = vmatmul.mubr.f32.vlgmr.msra.gmra.mrb[8].mxu0 %v4288_v20  ;;  %2791 = vmatmul.mubr.f32.vlgmr.msra.gmra.mrb[32].mxu1 %v4288_v20 }
 0x4b9   :  { %3289 = vmatpush1.bf16.msra.mxu0 %v4176_v4  ;;  %3320 = vmatpush3.bf16.msra.mxu1 %v4251_v8 }
 0x4ba   :  { %3291 = vmatprep.subr.bf16.mxu0 %v4180_v62  ;;  %3321 = vmatprep.subr.bf16.mxu1 %v3786_v23 }
 0x4bb   :  { %1643 = vmatprep.mubr.f32.mxu0 %v3785_v0  ;;  %2825 = vmatprep.mubr.msk.f32.mxu1 %vm3787_vm0, %v3785_v0 }
 0x4bd   :  { %3293 = vmatpush1.bf16.msra.mxu0 %v4182_v11  ;;  %3323 = vmatpush3.bf16.msra.mxu1 %v4255_v43 }
 0x4be   :  { %3295 = vmatprep.subr.bf16.mxu0 %v4186_v54  ;;  %3324 = vmatprep.subr.bf16.mxu1 %v3786_v23 }
 0x4c1   :  { %3297 = vmatpush1.bf16.msra.mxu0 %v4188_v7  ;;  %3326 = vmatpush3.bf16.msra.mxu1 %v4259_v14 }
 0x4c2   :  { %3299 = vmatprep.subr.bf16.mxu0 %v4192_v46  ;;  %3327 = vmatprep.subr.bf16.mxu1 %v3786_v23 }
 0x4c5   :  { %3301 = vmatpush1.bf16.msra.mxu0 %v4194_v26  ;;  %3329 = vmatpush3.bf16.msra.mxu1 %v4263_v56 }
 0x4c6   :  { %3303 = vmatprep.subr.bf16.mxu0 %v4198_v44  ;;  %3330 = vmatprep.subr.bf16.mxu1 %v3786_v23 }
 0x4c9   :  { %3305 = vmatpush1.bf16.msra.mxu0 %v4200_v1  ;;  %3332 = vmatpush3.bf16.msra.mxu1 %v4267_v13 }
 0x4ca   :  { %3307 = vmatprep.subr.bf16.mxu0 %v4203_v29  ;;  %3333 = vmatprep.subr.bf16.mxu1 %v3786_v23 }
 0x4cd   :  { %3309 = vmatpush1.bf16.msra.mxu0 %v4206_v10  ;;  %3335 = vmatpush3.bf16.msra.mxu1 %v4270_v39 }
 0x4ce   :  { %3311 = vmatprep.subr.bf16.mxu0 %v4209_v12  ;;  %3336 = vmatprep.subr.bf16.mxu1 %v3786_v23 }
 0x4d1   :  { %3313 = vmatpush1.bf16.msra.mxu0 %v4212_v33  ;;  %3338 = vmatpush3.bf16.msra.mxu1 %v4274_v6 }
 0x4d2   :  { %3315 = vmatprep.subr.bf16.mxu0 %v4215_v38  ;;  %3339 = vmatprep.subr.bf16.mxu1 %v3786_v23 }
 0x4d5   :  { %3317 = vmatpush1.bf16.msra.mxu0 %v4218_v3  ;;  %3341 = vmatpush3.bf16.msra.mxu1 %v4278_v16 }
 0x4d6   :  { %3343 = vmatprep.subr.bf16.mxu0 %v4174_v31  ;;  %3374 = vmatprep.subr.bf16.mxu1 %v3786_v23 }
 0x58b   :  { %v1424_v17 = vpop.f32.mrb[8].mxu0  ;;  %v1495_v18 = vpop.f32.mrb[32].mxu1 }
 0x58c   :  { %v1499_v34 = vadd.f32 %v1424_v17, %v4071_v32  ;;  %v1426_v41 = vpop.f32.mrb[9].mxu0  ;;  %v2792_v25 = vpop.f32.mrb[33].mxu1  ;;  %v1514_v31 = vadd.f32 %v1495_v18, %v4104_v53  ;;  %v1983_v17 = vld [vmem:[#allocation11 + $0x50] sm:$0xff] }
 0x58d   :  { %v1506_v63 = vadd.f32 %v1426_v41, %v4073_v36 }
 0x58e   :  { %v2381_v21 = vmul.f32 -1.442695, %v1499_v34  ;;  %v1982_v34 = vld [vmem:[#allocation11 + $0x48] sm:$0xff] }
 0x58f   :  { %v2382_v27 = vmul.f32 -1.442695, %v1506_v63  ;;  %v1988_v63 = vld [vmem:[#allocation11 + $0x78] sm:$0xff] }
 0x590   :  { %3572 = vpow2.f32 %v2381_v21 }
 0x591   :  { %3574 = vpow2.f32 %v2382_v27  ;;  %v1992_v27 = vld [vmem:[#allocation11 + $0x98] sm:$0xff] }
 0x59a   :  { %v3573_v48 = vpop.eup %3572 }
 0x59b   :  { %v1503_v51 = vadd.f32 1.0, %v3573_v48  ;;  %v3575_v19 = vpop.eup %3574  ;;  %v1995_v48 = vld [vmem:[#allocation11 + $0xb0] sm:$0xff] }
 0x59c   :  { %v1510_v22 = vadd.f32 1.0, %v3575_v19  ;;  %v1991_v19 = vld [vmem:[#allocation11 + $0x90] sm:$0xff] }
 0x59d   :  { %3576 = vrcp.f32 %v1503_v51  ;;  %v3410_v51 = vpack.c.bf16 %v1995_v48, %v1992_v27  ;;  %v2198_v27 = vld [vmem:[#allocation13 + $0x18] sm:$0xff] }
 0x5a7   :  { %v3577_v59 = vpop.eup %3576 }
 0x5a8   :  { %v1515_v37 = vmul.f32 %v3577_v59, %v1514_v31  ;;  %v1994_v31 = vld [vmem:[#allocation11 + $0xa8] sm:$0xff] }
 0x5a9   :  { %v3412_v59 = vpack.c.bf16 %v1994_v31, %v1991_v19  ;;  %v2199_v31 = vld [vmem:[#allocation13 + $0x20] sm:$0xff] }
 0x5aa   :  { %v1516_v5 = vadd.f32 %v1515_v37, %v4095_v9  ;;  %v1998_v37 = vld [vmem:[#allocation11 + $0xc8] sm:$0xff] }
 0x5ac   :  { %3578 = vtanh.f32 %v1516_v5  ;;  %v2001_v5 = vld [vmem:[#allocation11 + $0xe0] sm:$0xff] }
 0x5ad   :  { %3580 = vrcp.f32 %v1510_v22  ;;  %v3414_v22 = vpack.c.bf16 %v2001_v5, %v1998_v37  ;;  %v2201_v37 = vld [vmem:[#allocation13 + $0x30] sm:$0xff]  ;;  %v2202_v5 = vld [vmem:[#allocation13 + $0x38] sm:$0xff] }
 0x5b6   :  { %v3579_v32 = vpop.eup %3578 }
 0x5b7   :  { %v1518_v36 = vsub.f32 %v4288_v20, %v3579_v32  ;;  %v3581_v35 = vpop.eup %3580 }
 0x5b9   :  { %v1519_v52 = vmul.f32 %v3581_v35, %v1518_v36  ;;  %v2000_v36 = vld [vmem:[#allocation11 + $0xd8] sm:$0xff] }
 0x5bb   :  { %v4332_v24 = vadd.f32 %v3579_v32, %v1519_v52  ;;  %v1997_v32 = vld [vmem:[#allocation11 + $0xc0] sm:$0xff]  ;;  %v2004_v52 = vld [vmem:[#allocation11 + $0xf8] sm:$0xff] }
 0x5bc   :  { %v3416_v35 = vpack.c.bf16 %v2000_v36, %v1997_v32  ;;  %v2203_v32 = vld [vmem:[#allocation13 + $0x40] sm:$0xff]  ;;  %v2204_v36 = vld [vmem:[#allocation13 + $0x48] sm:$0xff] }
 0x5bd   :  { %1644 = vmatmul.mubr.f32.vlgmr.msra.gmra.mrb[10].mxu0 %v4332_v24  ;;  %2826 = vmatmul.mubr.f32.vlgmr.msra.gmra.mrb[34].mxu1 %v4332_v24 }
 0x5be   :  { %3345 = vmatpush1.bf16.msra.mxu0 %v4176_v4  ;;  %3376 = vmatpush3.bf16.msra.mxu1 %v4251_v8 }
 0x5bf   :  { %3347 = vmatprep.subr.bf16.mxu0 %v4180_v62  ;;  %3377 = vmatprep.subr.bf16.mxu1 %v3786_v23 }
 0x5c0   :  { %1864 = vmatprep.mubr.f32.mxu0 %v3785_v0  ;;  %2860 = vmatprep.mubr.msk.f32.mxu1 %vm3787_vm0, %v3785_v0 }
 0x5c2   :  { %3349 = vmatpush1.bf16.msra.mxu0 %v4182_v11  ;;  %3379 = vmatpush3.bf16.msra.mxu1 %v4255_v43 }
 0x5c3   :  { %3351 = vmatprep.subr.bf16.mxu0 %v4186_v54  ;;  %3380 = vmatprep.subr.bf16.mxu1 %v3786_v23 }
 0x5c6   :  { %3353 = vmatpush1.bf16.msra.mxu0 %v4188_v7  ;;  %3382 = vmatpush3.bf16.msra.mxu1 %v4259_v14 }
 0x5c7   :  { %3355 = vmatprep.subr.bf16.mxu0 %v4192_v46  ;;  %3383 = vmatprep.subr.bf16.mxu1 %v3786_v23 }
 0x5ca   :  { %3357 = vmatpush1.bf16.msra.mxu0 %v4194_v26  ;;  %3385 = vmatpush3.bf16.msra.mxu1 %v4263_v56 }
 0x5cb   :  { %3359 = vmatprep.subr.bf16.mxu0 %v4198_v44  ;;  %3386 = vmatprep.subr.bf16.mxu1 %v3786_v23 }
 0x5ce   :  { %3361 = vmatpush1.bf16.msra.mxu0 %v4200_v1  ;;  %3388 = vmatpush3.bf16.msra.mxu1 %v4267_v13  ;;  %v4375_v1 = vld [vmem:[%s4458_s5] sm:$0xff] }
 0x5cf   :  { %3363 = vmatprep.subr.bf16.mxu0 %v4203_v29  ;;  %3389 = vmatprep.subr.bf16.mxu1 %v3786_v23 }
 0x5d2   :  { %3365 = vmatpush1.bf16.msra.mxu0 %v4206_v10  ;;  %3391 = vmatpush3.bf16.msra.mxu1 %v4270_v39 }
 0x5d3   :  { %3367 = vmatprep.subr.bf16.mxu0 %v4209_v12  ;;  %3392 = vmatprep.subr.bf16.mxu1 %v3786_v23 }
 0x5d6   :  { %3369 = vmatpush1.bf16.msra.mxu0 %v4212_v33  ;;  %3394 = vmatpush3.bf16.msra.mxu1 %v4274_v6 }
 0x5d7   :  { %3371 = vmatprep.subr.bf16.mxu0 %v4215_v38  ;;  %3395 = vmatprep.subr.bf16.mxu1 %v3786_v23 }
 0x5da   :  { %3373 = vmatpush1.bf16.msra.mxu0 %v4218_v3  ;;  %3397 = vmatpush3.bf16.msra.mxu1 %v4278_v16 }
 0x5db   :  { %3430 = vmatprep.subr.bf16.mxu1 %v3786_v23 }
 0x690   :  { %v1645_v9 = vpop.f32.mrb[10].mxu0  ;;  %v1716_v53 = vpop.f32.mrb[34].mxu1 }
 0x691   :  { %v1720_v4 = vadd.f32 %v1645_v9, %v4075_v40  ;;  %v1647_v62 = vpop.f32.mrb[11].mxu0  ;;  %v2827_v11 = vpop.f32.mrb[35].mxu1  ;;  %v1735_v10 = vadd.f32 %v4375_v1, %v1716_v53  ;;  %v2007_v9 = vld [vmem:[#allocation11 + $0x110] sm:$0xff] }
 0x692   :  { %v1727_v54 = vadd.f32 %v1647_v62, %v4077_v45  ;;  %v2003_v53 = vld [vmem:[#allocation11 + $0xf0] sm:$0xff]  ;;  %v2006_v62 = vld [vmem:[#allocation11 + $0x108] sm:$0xff] }
 0x693   :  { %v2383_v7 = vmul.f32 -1.442695, %v1720_v4  ;;  %v3418_v4 = vpack.c.bf16 %v2007_v9, %v2004_v52  ;;  %v2010_v11 = vld [vmem:[#allocation11 + $0x128] sm:$0xff]  ;;  %v2205_v52 = vld [vmem:[#allocation13 + $0x50] sm:$0xff]  ;;  %v2206_v9 = vld [vmem:[#allocation13 + $0x58] sm:$0xff] }
 0x694   :  { %v2384_v46 = vmul.f32 -1.442695, %v1727_v54  ;;  %v2013_v54 = vld [vmem:[#allocation11 + $0x140] sm:$0xff] }
 0x695   :  { %3582 = vpow2.f32 %v2383_v7  ;;  %v3420_v7 = vpack.c.bf16 %v2006_v62, %v2003_v53  ;;  %v3474_v53 = vpack.c.bf16 %v2206_v9, %v2205_v52  ;;  %v2208_v62 = vld [vmem:[#allocation13 + $0x68] sm:$0xff] }
 0x696   :  { %3584 = vpow2.f32 %v2384_v46  ;;  %v3422_v46 = vpack.c.bf16 %v2013_v54, %v2010_v11  ;;  %v2209_v11 = vld [vmem:[#allocation13 + $0x70] sm:$0xff]  ;;  %v2210_v54 = vld [vmem:[#allocation13 + $0x78] sm:$0xff] }
 0x69f   :  { %v3583_v26 = vpop.eup %3582 }
 0x6a0   :  { %v1724_v44 = vadd.f32 1.0, %v3583_v26  ;;  %v3585_v29 = vpop.eup %3584  ;;  %v2009_v26 = vld [vmem:[#allocation11 + $0x120] sm:$0xff] }
 0x6a1   :  { %v1731_v45 = vadd.f32 1.0, %v3585_v29  ;;  %v2016_v29 = vld [vmem:[#allocation11 + $0x158] sm:$0xff] }
 0x6a2   :  { %3586 = vrcp.f32 %v1724_v44  ;;  %v2012_v44 = vld [vmem:[#allocation11 + $0x138] sm:$0xff] }
 0x6ac   :  { %v3587_v40 = vpop.eup %3586 }
 0x6ad   :  { %v1736_v12 = vmul.f32 %v3587_v40, %v1735_v10  ;;  %v2019_v10 = vld [vmem:[#allocation11 + $0x170] sm:$0xff]  ;;  %v3424_v40 = vpack.c.bf16 %v2012_v44, %v2009_v26 }
 0x6af   :  { %v1737_v33 = vadd.f32 %v1736_v12, %v4093_v30  ;;  %v1977_v30 = vld [vmem:[#allocation11 + $0x20] sm:$0xff]  ;;  %v3426_v12 = vpack.c.bf16 %v2019_v10, %v2016_v29 }
 0x6b1   :  { %3588 = vtanh.f32 %v1737_v33  ;;  %v2015_v33 = vld [vmem:[#allocation11 + $0x150] sm:$0xff] }
 0x6b2   :  { %3590 = vrcp.f32 %v1731_v45  ;;  %v2018_v45 = vld [vmem:[#allocation11 + $0x168] sm:$0xff] }
 0x6bb   :  { %v3589_v38 = vpop.eup %3588 }
 0x6bc   :  { %v1739_v3 = vsub.f32 %v4332_v24, %v3589_v38  ;;  %v3591_v28 = vpop.eup %3590 }
 0x6be   :  { %v1740_v57 = vmul.f32 %v3591_v28, %v1739_v3  ;;  %v2196_v3 = vld [vmem:[#allocation13 + $0x8] sm:$0xff]  ;;  %v3428_v28 = vpack.c.bf16 %v2018_v45, %v2015_v33 }
 0x6c0   :  { %v4380_v15 = vadd.f32 %v3589_v38, %v1740_v57  ;;  %v2195_v38 = vld [vmem:[#allocation13] sm:$0xff] }
 0x6c1   :  { %v3454_v57 = vpack.c.bf16 %v2196_v3, %v2195_v38 }
 0x6c2   :  { %1865 = vmatmul.mubr.f32.vlgmr.msra.gmra.mrb[12].mxu0 %v4380_v15  ;;  %2861 = vmatmul.mubr.f32.vlgmr.msra.gmra.mrb[36].mxu1 %v4380_v15 }
 0x6c3   :  { %3432 = vmatpush3.bf16.msra.mxu1 %v4251_v8  ;;  %2085 = vmatprep.mubr.f32.mxu0 %v3785_v0 }
 0x6c4   :  { %3433 = vmatprep.subr.bf16.mxu1 %v3786_v23  ;;  %2895 = vmatprep.mubr.msk.f32.mxu1 %vm3787_vm0, %v3785_v0  ;;  %v1974_v0 = vld [vmem:[#allocation11 + $0x8] sm:$0xff] }
 0x6c5   :  { %v3398_v8 = vpack.c.bf16 %v1977_v30, %v1974_v0 }
 0x6c7   :  { %3435 = vmatpush3.bf16.msra.mxu1 %v4255_v43  ;;  %v1973_v43 = vld [vmem:[#allocation11] sm:$0xff]  ;;  %3399 = vmatprep.subr.bf16.mxu0 %v3398_v8 }
 0x6c8   :  { %3436 = vmatprep.subr.bf16.mxu1 %v3786_v23 }
 0x6cb   :  { %3438 = vmatpush3.bf16.msra.mxu1 %v4259_v14  ;;  %v1976_v14 = vld [vmem:[#allocation11 + $0x18] sm:$0xff] }
 0x6cc   :  { %3439 = vmatprep.subr.bf16.mxu1 %v3786_v23 }
 0x6cf   :  { %3441 = vmatpush3.bf16.msra.mxu1 %v4263_v56  ;;  %v3400_v56 = vpack.c.bf16 %v1976_v14, %v1973_v43 }
 0x6d0   :  { %3442 = vmatprep.subr.bf16.mxu1 %v3786_v23 }
 0x6d1   :  { %3401 = vmatpush1.bf16.msra.mxu0 %v3400_v56 }
 0x6d3   :  { %3444 = vmatpush3.bf16.msra.mxu1 %v4267_v13  ;;  %v1980_v13 = vld [vmem:[#allocation11 + $0x38] sm:$0xff] }
 0x6d4   :  { %3445 = vmatprep.subr.bf16.mxu1 %v3786_v23  ;;  %v3402_v18 = vpack.c.bf16 %v1983_v17, %v1980_v13 }
 0x6d6   :  { %3403 = vmatprep.subr.bf16.mxu0 %v3402_v18 }
 0x6d7   :  { %3447 = vmatpush3.bf16.msra.mxu1 %v4270_v39  ;;  %v1979_v39 = vld [vmem:[#allocation11 + $0x30] sm:$0xff] }
 0x6d8   :  { %3448 = vmatprep.subr.bf16.mxu1 %v3786_v23  ;;  %v3404_v41 = vpack.c.bf16 %v1982_v34, %v1979_v39 }
 0x6da   :  { %3405 = vmatpush1.bf16.msra.mxu0 %v3404_v41 }
 0x6db   :  { %3450 = vmatpush3.bf16.msra.mxu1 %v4274_v6  ;;  %v1986_v6 = vld [vmem:[#allocation11 + $0x68] sm:$0xff] }
 0x6dc   :  { %3451 = vmatprep.subr.bf16.mxu1 %v3786_v23  ;;  %v1989_v23 = vld [vmem:[#allocation11 + $0x80] sm:$0xff] }
 0x6dd   :  { %v3406_v25 = vpack.c.bf16 %v1989_v23, %v1986_v6 }
 0x6df   :  { %3453 = vmatpush3.bf16.msra.mxu1 %v4278_v16  ;;  %v1985_v16 = vld [vmem:[#allocation11 + $0x60] sm:$0xff]  ;;  %3407 = vmatprep.subr.bf16.mxu0 %v3406_v25 }
 0x6e0   :  { %v3408_v21 = vpack.c.bf16 %v1988_v63, %v1985_v16 }
 0x6e2   :  { %3409 = vmatpush1.bf16.msra.mxu0 %v3408_v21  ;;  %v2197_v21 = vld [vmem:[#allocation13 + $0x10] sm:$0xff] }
 0x6e3   :  { %3411 = vmatprep.subr.bf16.mxu0 %v3410_v51  ;;  %v3458_v19 = vpack.c.bf16 %v2198_v27, %v2197_v21 }
 0x6e6   :  { %3413 = vmatpush1.bf16.msra.mxu0 %v3412_v59  ;;  %v2200_v59 = vld [vmem:[#allocation13 + $0x28] sm:$0xff] }
 0x6e7   :  { %3415 = vmatprep.subr.bf16.mxu0 %v3414_v22  ;;  %v3466_v22 = vpack.c.bf16 %v2202_v5, %v2201_v37 }
 0x6ea   :  { %3417 = vmatpush1.bf16.msra.mxu0 %v3416_v35  ;;  %v3470_v35 = vpack.c.bf16 %v2204_v36, %v2203_v32 }
 0x6eb   :  { %3419 = vmatprep.subr.bf16.mxu0 %v3418_v4  ;;  %v2207_v4 = vld [vmem:[#allocation13 + $0x60] sm:$0xff] }
 0x6ee   :  { %3421 = vmatpush1.bf16.msra.mxu0 %v3420_v7  ;;  %v3482_v7 = vpack.c.bf16 %v2210_v54, %v2209_v11 }
 0x6ef   :  { %3423 = vmatprep.subr.bf16.mxu0 %v3422_v46 }
 0x6f2   :  { %3425 = vmatpush1.bf16.msra.mxu0 %v3424_v40 }
 0x6f3   :  { %3427 = vmatprep.subr.bf16.mxu0 %v3426_v12 }
 0x6f6   :  { %3429 = vmatpush1.bf16.msra.mxu0 %v3428_v28 }
 0x6f7   :  { %3455 = vmatprep.subr.bf16.mxu0 %v3454_v57 }
 0x795   :  { %v1866_v0 = vpop.f32.mrb[12].mxu0  ;;  %v1937_v30 = vpop.f32.mrb[36].mxu1 }
 0x796   :  { %v1941_v8 = vadd.f32 %v1866_v0, %v4079_v49  ;;  %v1868_v43 = vpop.f32.mrb[13].mxu0  ;;  %v2862_v14 = vpop.f32.mrb[37].mxu1  ;;  %v1956_v41 = vadd.f32 %v1937_v30, %v4375_v1 }
 0x797   :  { %v1948_v56 = vadd.f32 %v1868_v43, %v4081_v55 }
 0x798   :  { %v2385_v13 = vmul.f32 -1.442695, %v1941_v8 }
 0x799   :  { %v2386_v17 = vmul.f32 -1.442695, %v1948_v56 }
 0x79a   :  { %3592 = vpow2.f32 %v2385_v13 }
 0x79b   :  { %3594 = vpow2.f32 %v2386_v17 }
 0x7a4   :  { %v3593_v18 = vpop.eup %3592 }
 0x7a5   :  { %v1945_v39 = vadd.f32 1.0, %v3593_v18  ;;  %v3595_v34 = vpop.eup %3594 }
 0x7a6   :  { %v1952_v16 = vadd.f32 1.0, %v3595_v34 }
 0x7a7   :  { %3596 = vrcp.f32 %v1945_v39 }
 0x7b1   :  { %v3597_v6 = vpop.eup %3596 }
 0x7b2   :  { %v1957_v23 = vmul.f32 %v3597_v6, %v1956_v41 }
 0x7b4   :  { %v1958_v25 = vadd.f32 %v1957_v23, %v4099_v42  ;;  %v3462_v42 = vpack.c.bf16 %v2200_v59, %v2199_v31 }
 0x7b6   :  { %3598 = vtanh.f32 %v1958_v25 }
 0x7b7   :  { %3600 = vrcp.f32 %v1952_v16 }
 0x7c0   :  { %v3599_v49 = vpop.eup %3598 }
 0x7c1   :  { %v1960_v55 = vsub.f32 %v4380_v15, %v3599_v49  ;;  %v3601_v63 = vpop.eup %3600 }
 0x7c3   :  { %v1961_v48 = vmul.f32 %v3601_v63, %v1960_v55 }
 0x7c5   :  { %v4407_v51 = vadd.f32 %v3599_v49, %v1961_v48 }
 0x7c7   :  { %2086 = vmatmul.mubr.f32.vlgmr.msra.gmra.mrb[14].mxu0 %v4407_v51  ;;  %2896 = vmatmul.mubr.f32.vlgmr.msra.gmra.mrb[38].mxu1 %v4407_v51 }
 0x7c8   :  { %3457 = vmatpush3.bf16.msra.mxu0 %v3454_v57  ;;  %2930 = vmatprep.mubr.f32.mxu0 %v4108_v50  ;;  %v3478_v50 = vpack.c.bf16 %v2208_v62, %v2207_v4 }
 0x7c9   :  { %3459 = vmatprep.subr.bf16.mxu0 %v3458_v19 }
 0x7cc   :  { %3461 = vmatpush3.bf16.msra.mxu0 %v3458_v19 }
 0x7cd   :  { %3463 = vmatprep.subr.bf16.mxu0 %v3462_v42 }
 0x7d0   :  { %3465 = vmatpush3.bf16.msra.mxu0 %v3462_v42 }
 0x7d1   :  { %3467 = vmatprep.subr.bf16.mxu0 %v3466_v22 }
 0x7d4   :  { %3469 = vmatpush3.bf16.msra.mxu0 %v3466_v22 }
 0x7d5   :  { %3471 = vmatprep.subr.bf16.mxu0 %v3470_v35 }
 0x7d8   :  { %3473 = vmatpush3.bf16.msra.mxu0 %v3470_v35 }
 0x7d9   :  { %3475 = vmatprep.subr.bf16.mxu0 %v3474_v53 }
 0x7dc   :  { %3477 = vmatpush3.bf16.msra.mxu0 %v3474_v53 }
 0x7dd   :  { %3479 = vmatprep.subr.bf16.mxu0 %v3478_v50 }
 0x7e0   :  { %3481 = vmatpush3.bf16.msra.mxu0 %v3478_v50 }
 0x7e1   :  { %3483 = vmatprep.subr.bf16.mxu0 %v3482_v7 }
 0x7e4   :  { %3485 = vmatpush3.bf16.msra.mxu0 %v3482_v7 }
 0x7e7   :  { %2931 = vmatmul.mubr.f32.vlgmr.msra.gmra.mrb[16].mxu0 %v4151_v58 }
 0x7e8   :  { %2933 = vmatprep.mubr.f32.mxu0 %v4228_v47 }
 0x7eb   :  { %2934 = vmatmul.mubr.f32.gmra.mrb[18].mxu0 %v4288_v20 }
 0x7ec   :  { %2936 = vmatprep.mubr.f32.mxu0 %v4332_v24 }
 0x7ef   :  { %2937 = vmatmul.mubr.f32.gmra.mrb[20].mxu0 %v4380_v15 }
 0x7f0   :  { %2939 = vmatprep.mubr.f32.mxu0 %v4407_v51 }
 0x89a   :  { %v2087_v46 = vpop.f32.mrb[14].mxu0  ;;  %v2158_v26 = vpop.f32.mrb[38].mxu1 }
 0x89b   :  { %v2162_v44 = vadd.f32 %v2087_v46, %v4083_v61  ;;  %v2089_v29 = vpop.f32.mrb[15].mxu0  ;;  %v2897_v10 = vpop.f32.mrb[39].mxu1  ;;  %v2177_v24 = vadd.f32 %v2158_v26, %v4375_v1  ;;  %v2389_v61 = vld [vmem:[%s4460_s7] ss:$0 sm:$0xff]  ;;  %s3788_s7 = smov [#allocation15]  }
 0x89c   :  { %v2169_v40 = vadd.f32 %v2089_v29, %v4085_v2  ;;  %s2351_s13 = sshll.u32 %s3788_s7, 4  ;;  %s2352_s13 = int_to_ptr.vmem [resolvable:$true] %s2351_s13 }
 0x89d   :  { %v2387_v12 = vmul.f32 -1.442695, %v2162_v44  ;;  %s3722_s14 = scalar_lea.vmem %s2352_s13, 128  ;;  %p3727_p13 = scmp.lt.s32.totalorder %s2352_s13, %s2352_s13 }
 0x89e   :  { %v2388_v58 = vmul.f32 -1.442695, %v2169_v40  ;;  %p3723_p12 = scmp.ne.s32.totalorder %s2352_s13, %s3722_s14  ;;  %p3728_p0 = scmp.lt.s32.totalorder %s3722_s14, %s3722_s14 }
 0x89f   :  { %3602 = vpow2.f32 %v2387_v12 }
 0x8a0   :  { %3604 = vpow2.f32 %v2388_v58  ;;  %p3729_p1 = por %p3728_p0, %p3727_p13 }
 0x8a2   :  { %p3730_p2 = pnand %p3729_p1, %p3723_p12 }
 0x8a9   :  { %v3603_v47 = vpop.eup %3602 }
 0x8aa   :  { %v2166_v33 = vadd.f32 1.0, %v3603_v47  ;;  %v3605_v20 = vpop.eup %3604 }
 0x8ab   :  { %v2173_v3 = vadd.f32 1.0, %v3605_v20 }
 0x8ac   :  { %3606 = vrcp.f32 %v2166_v33 }
 0x8b6   :  { %v3607_v15 = vpop.eup %3606 }
 0x8b7   :  { %v2178_v45 = vmul.f32 %v3607_v15, %v2177_v24 }
 0x8b9   :  { %v2179_v38 = vadd.f32 %v2178_v45, %v4097_v60 }
 0x8ba   :  { %v2932_v2 = vpop.f32.mrb[16].mxu0 }
 0x8bb   :  { %3608 = vtanh.f32 %v2179_v38  ;;  %v2290_v28 = vadd.f32 %v2932_v2, %v2389_v61  ;;  %v2284_v57 = vpop.f32.mrb[17].mxu0 }
 0x8bc   :  { %v2285_v0 = vadd.f32 %v2389_v61, %v2284_v57  ;;  %3610 = vrcp.f32 %v2173_v3 }
 0x8bd   :  { %2324 = vst [vmem:[#allocation14 + $0x8] sm:$0xff] %v2290_v28 }
 0x8be   :  { %2323 = vst [vmem:[#allocation14] sm:$0xff] %v2285_v0  ;;  %v2935_v30 = vpop.f32.mrb[18].mxu0 }
 0x8bf   :  { %v2300_v8 = vadd.f32 %v2935_v30, %v2389_v61  ;;  %v2294_v1 = vpop.f32.mrb[19].mxu0 }
 0x8c0   :  { %v2295_v43 = vadd.f32 %v2389_v61, %v2294_v1 }
 0x8c1   :  { %2326 = vst [vmem:[#allocation14 + $0x18] sm:$0xff] %v2300_v8 }
 0x8c2   :  { %2325 = vst [vmem:[#allocation14 + $0x10] sm:$0xff] %v2295_v43  ;;  %v2938_v14 = vpop.f32.mrb[20].mxu0 }
 0x8c3   :  { %v2310_v56 = vadd.f32 %v2938_v14, %v2389_v61  ;;  %v2304_v13 = vpop.f32.mrb[21].mxu0 }
 0x8c4   :  { %v2305_v17 = vadd.f32 %v2389_v61, %v2304_v13 }
 0x8c5   :  { %v3609_v60 = vpop.eup %3608  ;;  %2328 = vst [vmem:[#allocation14 + $0x28] sm:$0xff] %v2310_v56 }
 0x8c6   :  { %2327 = vst [vmem:[#allocation14 + $0x20] sm:$0xff] %v2305_v17  ;;  %v2181_v18 = vsub.f32 %v4407_v51, %v3609_v60  ;;  %v3611_v39 = vpop.eup %3610 }
 0x8c8   :  { %v2182_v34 = vmul.f32 %v3611_v39, %v2181_v18 }
 0x8ca   :  { %v2183_v41 = vadd.f32 %v3609_v60, %v2182_v34 }
 0x8cc   :  { %2940 = vmatmul.mubr.f32.gmra.mrb[22].mxu0 %v2183_v41  ;;  %2332 = vst [vmem:[#allocation15] sm:$0xff] %v2183_v41 }
 0x8cd   :  { %3733 = shalt.err (!%p3730_p2)
}
 0x8ce   :  { %s3734_s17 = scalar_lea.hbm %s4462_s9, 128 }
 0x8cf   :  { %p3735_p3 = scmp.ne.s32.totalorder %s4462_s9, %s3734_s17  ;;  %p3738_p4 = scmp.lt.u32.totalorder %s3734_s17, %s4462_s9 }
 0x8d1   :  { %p3740_p5 = pnand %p3738_p4, %p3735_p3 }
 0x8d3   :  { %3743 = shalt.err (!%p3740_p5)
}
 0x8d4   :  { %2354 = dma.vmem_to_hbm [thread:$0]  %s2352_s13, 128, %s4462_s9, [#allocation16]  }
 0x8d5   :  { %s3789_s23 = smov [#allocation14]  }
 0x8d6   :  { %s2338_s25 = sshll.u32 %s3789_s23, 4  ;;  %s2339_s25 = int_to_ptr.vmem [resolvable:$true] %s2338_s25 }
 0x8d7   :  { %s3744_s26 = scalar_lea.vmem %s2339_s25, 1024  ;;  %p3749_p7 = scmp.lt.s32.totalorder %s2339_s25, %s2339_s25 }
 0x8d8   :  { %p3745_p6 = scmp.ne.s32.totalorder %s2339_s25, %s3744_s26  ;;  %p3750_p8 = scmp.lt.s32.totalorder %s3744_s26, %s3744_s26 }
 0x8da   :  { %p3751_p9 = por %p3750_p8, %p3749_p7 }
 0x8dc   :  { %p3752_p10 = pnand %p3751_p9, %p3745_p6 }
 0x99f   :  { %v2941_v6 = vpop.f32.mrb[22].mxu0 }
 0x9a0   :  { %v2320_v23 = vadd.f32 %v2941_v6, %v2389_v61  ;;  %v2314_v25 = vpop.f32.mrb[23].mxu0 }
 0x9a1   :  { %v2315_v16 = vadd.f32 %v2389_v61, %v2314_v25 }
 0x9a2   :  { %2330 = vst [vmem:[#allocation14 + $0x38] sm:$0xff] %v2320_v23 }
 0x9a3   :  { %2329 = vst [vmem:[#allocation14 + $0x30] sm:$0xff] %v2315_v16 }
 0x9a4   :  { %3755 = shalt.err (!%p3752_p10)
}
 0x9a5   :  { %s3756_s9 = scalar_lea.hbm %s4461_s8, 1024 }
 0x9a6   :  { %p3757_p11 = scmp.ne.s32.totalorder %s4461_s8, %s3756_s9  ;;  %p3760_p12 = scmp.lt.u32.totalorder %s3756_s9, %s4461_s8 }
 0x9a8   :  { %p3762_p13 = pnand %p3760_p12, %p3757_p11 }
 0x9aa   :  { %3765 = shalt.err (!%p3762_p13)
}
 0x9ab   :  { %2344 = dma.vmem_to_hbm [thread:$0]  %s2339_s25, 1024, %s4461_s8, [#allocation7], %s3781_s4, %s3781_s4, %s3782_s22  }
 0x9ac   :  { %3772 = dma.done.wait [#allocation7], 1024  }
 0x9ad   :  { %3773 = vsyncadd [#allocation7], 4294966272 }
 0x9ae   :  { %3774 = dma.done.wait [#allocation16], 128  }
 0x9af   :  { %3775 = vsyncadd [#allocation16], 4294967168 }
 0x9b0   :  { %2361 = vsyncpa [#allocation6], 1 }
 0x9b1   :  { %2362 = vsyncpa [#allocation9], 1 }
 0x9b2   :  { %2363 = vsyncpa [#allocation12], 1 }
 0x9b3   :  { %2364 = vsyncpa [#allocation7], 1 }
 0x9b4   :  { %2365 = vsyncpa [#allocation16], 1 }

</bundles_post_ra>
